<compile_context>
chip_gen: v7x
topology: tpu7x:2x2x1
jax: 0.10.0
libtpu: 0.0.40
codegen_flags: <defaults>
</compile_context>

<pallas_src>
import functools

import jax
import jax.numpy as jnp
from jax.experimental import pallas as pl
from jax.experimental.pallas import tpu as pltpu

LANE = 128


def _round_up(x, m):
    return (x + m - 1) // m * m


def gru_seq_kernel(gi_ref,       # (Tc, 3Hp) f32  precomputed x@W_ih^T + biases (r,z,n on lanes)
                   h0_ref,       # (1, Hp)   f32  initial hidden state
                   whh_hbm_ref,  # (Hp, 3Hp) bf16 recurrent weights, raw HBM ref (ANY)
                   bhn_ref,      # (1, Hp)   f32  b_hh_n (kept separate because of r*)
                   out_ref,      # (Tc, Hp)  f32  hidden states for this time block
                   whh_vmem,     # (Hp, 3Hp) bf16 VMEM scratch: resident, single-buffered W_hh
                   h_scratch,    # (1, Hp)   f32  VMEM-resident hidden state
                   dma_sem,      # DMA semaphore for the one-time weight load
                   *, hp, tc):
    blk = pl.program_id(0)

    @pl.when(blk == 0)
    def _():
        # Load the recurrent weight once; it stays resident for all grid steps.
        cp = pltpu.make_async_copy(whh_hbm_ref, whh_vmem, dma_sem)
        cp.start()
        cp.wait()
        h_scratch[...] = h0_ref[...]

    whh = whh_vmem[...]          # (Hp, 3Hp) bf16, gates r|z|n concatenated on lanes
    bhn = bhn_ref[...]           # (1, Hp) f32

    def step(i, h):
        gi = gi_ref[pl.ds(i, 1), :]                        # (1, 3Hp), precomputed
        # Only in-loop MXU matmul: hidden->gates.
        gh = jnp.dot(h.astype(jnp.bfloat16), whh,
                     preferred_element_type=jnp.float32)   # (1, 3Hp) f32
        rz = jax.nn.sigmoid(gi[:, :2 * hp] + gh[:, :2 * hp])   # r,z together
        r = rz[:, :hp]
        z = rz[:, hp:]
        n = jnp.tanh(gi[:, 2 * hp:] + r * (gh[:, 2 * hp:] + bhn))
        h_new = (1.0 - z) * n + z * h                      # elementwise math in f32
        out_ref[pl.ds(i, 1), :] = h_new.astype(out_ref.dtype)
        return h_new

    h_scratch[...] = jax.lax.fori_loop(0, tc, step, h_scratch[...], unroll=True)


def gru_encode(params, tokens, hidden, *, tc=None):
    """Run the EncoderRNN GRU over a token sequence inside one pallas_call.

    tokens: (T,) int32 ; hidden: (1, 1, H) f32
    returns (outputs (T, 1, H), final_hidden (1, 1, H))
    """
    H = params["hidden_size"]
    Hp = params["hp"]
    gi_table = params["gi_table"]
    vocab = gi_table.shape[0]

    # NOTE: out-of-range ids are clipped (PyTorch nn.Embedding would raise).
    tokens = jnp.clip(jnp.asarray(tokens, jnp.int32).reshape(-1), 0, vocab - 1)
    T = int(tokens.shape[0])

    if tc is None:
        tc = min(32, _round_up(T, 8))      # 8..32 timesteps per grid step
    T_pad = _round_up(T, tc)

    # Hoisted input projection: gather per-token gate pre-activations (XLA gather).
    gi_all = jnp.take(gi_table, tokens, axis=0)            # (T, 3Hp) f32
    if T_pad != T:
        gi_all = jnp.pad(gi_all, ((0, T_pad - T), (0, 0)))  # pad steps are discarded

    h0 = jnp.zeros((1, Hp), jnp.float32).at[:, :H].set(
        hidden.reshape(1, H).astype(jnp.float32))

    # Explicit VMEM budget (single-buffered weights + double-buffered gi/out blocks).
    needed = (2 * tc * 3 * Hp * 4          # gi blocks (double-buffered)
              + 2 * tc * Hp * 4            # out blocks (double-buffered)
              + Hp * 3 * Hp * 2            # resident bf16 W_hh scratch
              + 16 * Hp * 4)               # h scratch / h0 / b_hh_n
    vmem_limit = int(max(needed + (4 << 20), 32 << 20))

    outs = pl.pallas_call(
        functools.partial(gru_seq_kernel, hp=Hp, tc=tc),
        out_shape=jax.ShapeDtypeStruct((T_pad, Hp), jnp.float32),
        grid_spec=pltpu.PrefetchScalarGridSpec(
            num_scalar_prefetch=0,
            grid=(T_pad // tc,),
            in_specs=[
                pl.BlockSpec((tc, 3 * Hp), lambda b: (b, 0)),   # gi time block
                pl.BlockSpec((1, Hp), lambda b: (0, 0)),        # h0 (read at blk==0)
                pl.BlockSpec(memory_space=pl.ANY),              # W_hh stays in HBM; DMA'd once
                pl.BlockSpec((1, Hp), lambda b: (0, 0)),        # b_hh_n
            ],
            out_specs=pl.BlockSpec((tc, Hp), lambda b: (b, 0)),
            scratch_shapes=[
                pltpu.VMEM((Hp, 3 * Hp), jnp.bfloat16),         # resident W_hh
                pltpu.VMEM((1, Hp), jnp.float32),               # resident hidden
                pltpu.SemaphoreType.DMA,                        # weight-load semaphore
            ],
        ),
        compiler_params=pltpu.CompilerParams(
            dimension_semantics=("arbitrary",),                 # time is a recurrence
            vmem_limit_bytes=vmem_limit),
    )(gi_all, h0, params["w_hh"], params["b_hn"])

    outputs = outs[:T, :H].reshape(T, 1, H)
    final_hidden = outputs[T - 1].reshape(1, 1, H)
    return outputs, final_hidden


def encoder_rnn_forward(params, token, hidden):
    """Equivalent of EncoderRNN.forward(input, hidden): one token, one GRU step."""
    outputs, new_hidden = gru_encode(
        params, jnp.asarray(token, jnp.int32).reshape(1), hidden)
    return outputs.reshape(1, 1, -1), new_hidden


# ------------------------- parameter construction -------------------------

def init_raw_params(key, vocab, hidden_size):
    """Raw f32 params in torch layout: w_* (3H, H), b_* (3H,), gate order (r,z,n)."""
    k = jax.random.split(key, 5)
    s = 1.0 / jnp.sqrt(float(hidden_size))
    return {
        "embedding": jax.random.normal(k[0], (vocab, hidden_size), jnp.float32),
        "w_ih": jax.random.uniform(k[1], (3 * hidden_size, hidden_size), jnp.float32, -s, s),
        "w_hh": jax.random.uniform(k[2], (3 * hidden_size, hidden_size), jnp.float32, -s, s),
        "b_ih": jax.random.uniform(k[3], (3 * hidden_size,), jnp.float32, -s, s),
        "b_hh": jax.random.uniform(k[4], (3 * hidden_size,), jnp.float32, -s, s),
    }


def prepare_params(raw, hidden_size):
    """Pack raw torch-layout params into lane-dense, padded kernel params.

    The input projection (embedding @ W_ih^T + biases) is folded into a
    per-token table so it never runs inside the recurrent loop.
    """
    H = hidden_size
    Hp = _round_up(max(H, LANE), LANE)
    vocab = raw["embedding"].shape[0]

    # ---- hoisted input projection table: (vocab, 3Hp) f32 ----
    gi = jnp.dot(raw["embedding"], raw["w_ih"].T,
                 precision=jax.lax.Precision.HIGHEST)        # (vocab, 3H)
    b = raw["b_ih"]
    b = b.at[:2 * H].add(raw["b_hh"][:2 * H])                # pre-fold b_hh for r,z
    gi = gi + b[None, :]
    gi_table = jnp.zeros((vocab, 3 * Hp), jnp.float32)
    for g in range(3):
        gi_table = gi_table.at[:, g * Hp:g * Hp + H].set(gi[:, g * H:(g + 1) * H])

    # ---- recurrent weight, pre-transposed, gates concatenated on lanes, bf16 ----
    w_hh = jnp.zeros((Hp, 3 * Hp), jnp.float32)
    for g in range(3):
        w_hh = w_hh.at[:H, g * Hp:g * Hp + H].set(raw["w_hh"][g * H:(g + 1) * H, :].T)

    b_hn = jnp.zeros((1, Hp), jnp.float32).at[0, :H].set(raw["b_hh"][2 * H:3 * H])

    return {
        "hidden_size": H,
        "hp": Hp,
        "gi_table": gi_table,
        "w_hh": w_hh.astype(jnp.bfloat16),   # bf16: halves resident VMEM / DMA bytes
        "b_hn": b_hn,
    }


# ------------------------------ reference ---------------------------------

def ref_gru_step(raw, H, tok, h):
    """Pure-JAX GRU step matching the kernel numerics (f32 gi, bf16 W_hh / h)."""
    f32 = lambda a: a.astype(jnp.float32)
    x = raw["embedding"][tok].reshape(1, H)
    gi = x @ raw["w_ih"].T + raw["b_ih"].reshape(1, 3 * H)
    hb = f32(h.astype(jnp.bfloat16))
    whh = f32(raw["w_hh"].astype(jnp.bfloat16))
    gh = hb @ whh.T + raw["b_hh"].reshape(1, 3 * H)
    r = jax.nn.sigmoid(gi[:, :H] + gh[:, :H])
    z = jax.nn.sigmoid(gi[:, H:2 * H] + gh[:, H:2 * H])
    n = jnp.tanh(gi[:, 2 * H:] + r * gh[:, 2 * H:])
    return (1.0 - z) * n + z * h


if __name__ == "__main__":
    vocab, H, T = 16, 32, 8
    key = jax.random.PRNGKey(0)
    raw = init_raw_params(key, vocab, H)
    params = prepare_params(raw, H)

    # --- single-step forward: exact EncoderRNN.forward(input, hidden) semantics ---
    token = jnp.array([5], dtype=jnp.int32)
    hidden0 = jnp.zeros((1, 1, H), dtype=jnp.float32)     # EncoderRNN.initHidden()
    output, hidden1 = encoder_rnn_forward(params, token, hidden0)
    jax.block_until_ready((output, hidden1))

    h_ref = ref_gru_step(raw, H, int(token[0]), hidden0.reshape(1, H))
    assert output.shape == (1, 1, H) and hidden1.shape == (1, 1, H)
    assert jnp.allclose(output.reshape(1, H), h_ref, atol=2e-2)
    assert jnp.allclose(hidden1.reshape(1, H), h_ref, atol=2e-2)

    # --- multi-token encode: whole sequence in ONE pallas_call (weights resident) ---
    tokens = jax.random.randint(jax.random.PRNGKey(1), (T,), 0, vocab, dtype=jnp.int32)
    outputs, final_hidden = gru_encode(params, tokens, hidden0)
    jax.block_until_ready((outputs, final_hidden))

    h = hidden0.reshape(1, H)
    refs = []
    for t in range(T):
        h = ref_gru_step(raw, H, int(tokens[t]), h)
        refs.append(h)
    refs = jnp.stack(refs).reshape(T, 1, H)
    assert outputs.shape == (T, 1, H) and final_hidden.shape == (1, 1, H)
    assert jnp.allclose(outputs, refs, atol=2e-2)
    assert jnp.allclose(final_hidden, refs[-1].reshape(1, 1, H), atol=2e-2)

    print("KERNEL_OK")
</pallas_src>

<mosaic_0001>
module attributes {stable_mosaic.version = 11 : i64} {
  func.func @gru_seq_kernel(%arg0: i32, %arg1: memref<8x384xf32, #tpu.memory_space<vmem>>, %arg2: memref<1x128xf32, #tpu.memory_space<vmem>>, %arg3: memref<128x384xbf16, #tpu.memory_space<any>>, %arg4: memref<1x128xf32, #tpu.memory_space<vmem>>, %arg5: memref<8x128xf32, #tpu.memory_space<vmem>>, %arg6: memref<128x384xbf16, #tpu.memory_space<vmem>>, %arg7: memref<1x128xf32, #tpu.memory_space<vmem>>, %arg8: memref<!tpu.dma_semaphore, #tpu.memory_space<semaphore_mem>>) attributes {dimension_semantics = [#tpu.dimension_semantics<arbitrary>], iteration_bounds = array<i64: 1>, scalar_prefetch = 0 : i64, scratch_operands = 3 : i64, tpu.core_type = #tpu.core_type<tc>, window_params = [{transform_indices = @transform_0, window_bounds = array<i64: 8, 384>}, {pipeline_mode = #tpu.pipeline_mode<synchronous>, transform_indices = @transform_1, window_bounds = array<i64: 1, 128>}, {}, {pipeline_mode = #tpu.pipeline_mode<synchronous>, transform_indices = @transform_3, window_bounds = array<i64: 1, 128>}, {transform_indices = @transform_4, window_bounds = array<i64: 8, 128>}]} {
    %c0_i32 = arith.constant 0 : i32
    %0 = arith.cmpi eq, %arg0, %c0_i32 : i32
    %1 = arith.extui %0 : i1 to i32
    %c0_i32_0 = arith.constant 0 : i32
    %2 = arith.cmpi ne, %1, %c0_i32_0 : i32
    scf.if %2 {
      tpu.enqueue_dma source(%arg3 : memref<128x384xbf16, #tpu.memory_space<any>>) target(%arg6 : memref<128x384xbf16, #tpu.memory_space<vmem>>) target_semaphore(%arg8 : memref<!tpu.dma_semaphore, #tpu.memory_space<semaphore_mem>>)
      tpu.wait_dma2 semaphore(%arg8 : memref<!tpu.dma_semaphore, #tpu.memory_space<semaphore_mem>>) src(%arg3 : memref<128x384xbf16, #tpu.memory_space<any>>) dst(%arg6 : memref<128x384xbf16, #tpu.memory_space<vmem>>)
      %c0_48 = arith.constant 0 : index
      %c0_49 = arith.constant 0 : index
      %223 = vector.load %arg2[%c0_48, %c0_49] : memref<1x128xf32, #tpu.memory_space<vmem>>, vector<1x128xf32>
      %c0_50 = arith.constant 0 : index
      %c0_51 = arith.constant 0 : index
      %224 = vector.load %arg7[%c0_50, %c0_51] : memref<1x128xf32, #tpu.memory_space<vmem>>, vector<1x128xf32>
      tpu.vector_store %arg7[%c0_50, %c0_51], %223 {strides = array<i32>} : memref<1x128xf32, #tpu.memory_space<vmem>>, vector<1x128xf32>,
    } else {
    }
    %c0 = arith.constant 0 : index
    %c0_1 = arith.constant 0 : index
    %3 = vector.load %arg6[%c0, %c0_1] : memref<128x384xbf16, #tpu.memory_space<vmem>>, vector<128x384xbf16>
    %c0_2 = arith.constant 0 : index
    %c0_3 = arith.constant 0 : index
    %4 = vector.load %arg4[%c0_2, %c0_3] : memref<1x128xf32, #tpu.memory_space<vmem>>, vector<1x128xf32>
    %c0_4 = arith.constant 0 : index
    %c0_5 = arith.constant 0 : index
    %5 = vector.load %arg7[%c0_4, %c0_5] : memref<1x128xf32, #tpu.memory_space<vmem>>, vector<1x128xf32>
    %c0_i32_6 = arith.constant 0 : i32
    %6 = arith.index_cast %c0_i32_6 : i32 to index
    %c0_7 = arith.constant 0 : index
    %7 = vector.load %arg1[%6, %c0_7] : memref<8x384xf32, #tpu.memory_space<vmem>>, vector<1x384xf32>
    %8 = arith.truncf %5 : vector<1x128xf32> to vector<1x128xbf16>
    %cst = arith.constant dense<0.000000e+00> : vector<1x384xf32>
    %9 = tpu.matmul %8, %3, %cst {dimension_numbers = #tpu.dot_dimension_numbers<[1], [0], [0], [1], [0, 0, 1, 1], [], []>} : vector<1x128xbf16>, vector<128x384xbf16>, vector<1x384xf32> -> vector<1x384xf32>
    %10 = vector.extract_strided_slice %7 {offsets = [0, 0], sizes = [1, 256], strides = [1, 1]} : vector<1x384xf32> to vector<1x256xf32>
    %11 = vector.extract_strided_slice %9 {offsets = [0, 0], sizes = [1, 256], strides = [1, 1]} : vector<1x384xf32> to vector<1x256xf32>
    %12 = arith.addf %10, %11 : vector<1x256xf32>
    %13 = arith.negf %12 : vector<1x256xf32>
    %14 = math.exp %13 : vector<1x256xf32>
    %cst_8 = arith.constant 1.000000e+00 : f32
    %15 = vector.broadcast %cst_8 : f32 to vector<1x256xf32>
    %16 = arith.addf %15, %14 : vector<1x256xf32>
    %17 = arith.divf %15, %16 : vector<1x256xf32>
    %18 = vector.extract_strided_slice %17 {offsets = [0, 0], sizes = [1, 128], strides = [1, 1]} : vector<1x256xf32> to vector<1x128xf32>
    %19 = vector.extract_strided_slice %17 {offsets = [0, 128], sizes = [1, 128], strides = [1, 1]} : vector<1x256xf32> to vector<1x128xf32>
    %20 = vector.extract_strided_slice %7 {offsets = [0, 256], sizes = [1, 128], strides = [1, 1]} : vector<1x384xf32> to vector<1x128xf32>
    %21 = vector.extract_strided_slice %9 {offsets = [0, 256], sizes = [1, 128], strides = [1, 1]} : vector<1x384xf32> to vector<1x128xf32>
    %22 = arith.addf %21, %4 : vector<1x128xf32>
    %23 = arith.mulf %18, %22 : vector<1x128xf32>
    %24 = arith.addf %20, %23 : vector<1x128xf32>
    %25 = math.tanh %24 : vector<1x128xf32>
    %cst_9 = arith.constant 1.000000e+00 : f32
    %26 = vector.broadcast %cst_9 : f32 to vector<1x128xf32>
    %27 = arith.subf %26, %19 : vector<1x128xf32>
    %28 = arith.mulf %27, %25 : vector<1x128xf32>
    %29 = arith.mulf %19, %5 : vector<1x128xf32>
    %30 = arith.addf %28, %29 : vector<1x128xf32>
    %31 = arith.index_cast %c0_i32_6 : i32 to index
    %c0_10 = arith.constant 0 : index
    %32 = vector.load %arg5[%31, %c0_10] : memref<8x128xf32, #tpu.memory_space<vmem>>, vector<1x128xf32>
    tpu.vector_store %arg5[%31, %c0_10], %30 {strides = array<i32>} : memref<8x128xf32, #tpu.memory_space<vmem>>, vector<1x128xf32>,
    %c1_i32 = arith.constant 1 : i32
    %33 = arith.index_cast %c1_i32 : i32 to index
    %c0_11 = arith.constant 0 : index
    %34 = vector.load %arg1[%33, %c0_11] : memref<8x384xf32, #tpu.memory_space<vmem>>, vector<1x384xf32>
    %35 = arith.truncf %30 : vector<1x128xf32> to vector<1x128xbf16>
    %cst_12 = arith.constant dense<0.000000e+00> : vector<1x384xf32>
    %36 = tpu.matmul %35, %3, %cst_12 {dimension_numbers = #tpu.dot_dimension_numbers<[1], [0], [0], [1], [0, 0, 1, 1], [], []>} : vector<1x128xbf16>, vector<128x384xbf16>, vector<1x384xf32> -> vector<1x384xf32>
    %37 = vector.extract_strided_slice %34 {offsets = [0, 0], sizes = [1, 256], strides = [1, 1]} : vector<1x384xf32> to vector<1x256xf32>
    %38 = vector.extract_strided_slice %36 {offsets = [0, 0], sizes = [1, 256], strides = [1, 1]} : vector<1x384xf32> to vector<1x256xf32>
    %39 = arith.addf %37, %38 : vector<1x256xf32>
    %40 = arith.negf %39 : vector<1x256xf32>
    %41 = math.exp %40 : vector<1x256xf32>
    %cst_13 = arith.constant 1.000000e+00 : f32
    %42 = vector.broadcast %cst_13 : f32 to vector<1x256xf32>
    %43 = arith.addf %42, %41 : vector<1x256xf32>
    %44 = arith.divf %42, %43 : vector<1x256xf32>
    %45 = vector.extract_strided_slice %44 {offsets = [0, 0], sizes = [1, 128], strides = [1, 1]} : vector<1x256xf32> to vector<1x128xf32>
    %46 = vector.extract_strided_slice %44 {offsets = [0, 128], sizes = [1, 128], strides = [1, 1]} : vector<1x256xf32> to vector<1x128xf32>
    %47 = vector.extract_strided_slice %34 {offsets = [0, 256], sizes = [1, 128], strides = [1, 1]} : vector<1x384xf32> to vector<1x128xf32>
    %48 = vector.extract_strided_slice %36 {offsets = [0, 256], sizes = [1, 128], strides = [1, 1]} : vector<1x384xf32> to vector<1x128xf32>
    %49 = arith.addf %48, %4 : vector<1x128xf32>
    %50 = arith.mulf %45, %49 : vector<1x128xf32>
    %51 = arith.addf %47, %50 : vector<1x128xf32>
    %52 = math.tanh %51 : vector<1x128xf32>
    %cst_14 = arith.constant 1.000000e+00 : f32
    %53 = vector.broadcast %cst_14 : f32 to vector<1x128xf32>
    %54 = arith.subf %53, %46 : vector<1x128xf32>
    %55 = arith.mulf %54, %52 : vector<1x128xf32>
    %56 = arith.mulf %46, %30 : vector<1x128xf32>
    %57 = arith.addf %55, %56 : vector<1x128xf32>
    %58 = arith.index_cast %c1_i32 : i32 to index
    %c0_15 = arith.constant 0 : index
    %59 = vector.load %arg5[%58, %c0_15] : memref<8x128xf32, #tpu.memory_space<vmem>>, vector<1x128xf32>
    tpu.vector_store %arg5[%58, %c0_15], %57 {strides = array<i32>} : memref<8x128xf32, #tpu.memory_space<vmem>>, vector<1x128xf32>,
    %c2_i32 = arith.constant 2 : i32
    %60 = arith.index_cast %c2_i32 : i32 to index
    %c0_16 = arith.constant 0 : index
    %61 = vector.load %arg1[%60, %c0_16] : memref<8x384xf32, #tpu.memory_space<vmem>>, vector<1x384xf32>
    %62 = arith.truncf %57 : vector<1x128xf32> to vector<1x128xbf16>
    %cst_17 = arith.constant dense<0.000000e+00> : vector<1x384xf32>
    %63 = tpu.matmul %62, %3, %cst_17 {dimension_numbers = #tpu.dot_dimension_numbers<[1], [0], [0], [1], [0, 0, 1, 1], [], []>} : vector<1x128xbf16>, vector<128x384xbf16>, vector<1x384xf32> -> vector<1x384xf32>
    %64 = vector.extract_strided_slice %61 {offsets = [0, 0], sizes = [1, 256], strides = [1, 1]} : vector<1x384xf32> to vector<1x256xf32>
    %65 = vector.extract_strided_slice %63 {offsets = [0, 0], sizes = [1, 256], strides = [1, 1]} : vector<1x384xf32> to vector<1x256xf32>
    %66 = arith.addf %64, %65 : vector<1x256xf32>
    %67 = arith.negf %66 : vector<1x256xf32>
    %68 = math.exp %67 : vector<1x256xf32>
    %cst_18 = arith.constant 1.000000e+00 : f32
    %69 = vector.broadcast %cst_18 : f32 to vector<1x256xf32>
    %70 = arith.addf %69, %68 : vector<1x256xf32>
    %71 = arith.divf %69, %70 : vector<1x256xf32>
    %72 = vector.extract_strided_slice %71 {offsets = [0, 0], sizes = [1, 128], strides = [1, 1]} : vector<1x256xf32> to vector<1x128xf32>
    %73 = vector.extract_strided_slice %71 {offsets = [0, 128], sizes = [1, 128], strides = [1, 1]} : vector<1x256xf32> to vector<1x128xf32>
    %74 = vector.extract_strided_slice %61 {offsets = [0, 256], sizes = [1, 128], strides = [1, 1]} : vector<1x384xf32> to vector<1x128xf32>
    %75 = vector.extract_strided_slice %63 {offsets = [0, 256], sizes = [1, 128], strides = [1, 1]} : vector<1x384xf32> to vector<1x128xf32>
    %76 = arith.addf %75, %4 : vector<1x128xf32>
    %77 = arith.mulf %72, %76 : vector<1x128xf32>
    %78 = arith.addf %74, %77 : vector<1x128xf32>
    %79 = math.tanh %78 : vector<1x128xf32>
    %cst_19 = arith.constant 1.000000e+00 : f32
    %80 = vector.broadcast %cst_19 : f32 to vector<1x128xf32>
    %81 = arith.subf %80, %73 : vector<1x128xf32>
    %82 = arith.mulf %81, %79 : vector<1x128xf32>
    %83 = arith.mulf %73, %57 : vector<1x128xf32>
    %84 = arith.addf %82, %83 : vector<1x128xf32>
    %85 = arith.index_cast %c2_i32 : i32 to index
    %c0_20 = arith.constant 0 : index
    %86 = vector.load %arg5[%85, %c0_20] : memref<8x128xf32, #tpu.memory_space<vmem>>, vector<1x128xf32>
    tpu.vector_store %arg5[%85, %c0_20], %84 {strides = array<i32>} : memref<8x128xf32, #tpu.memory_space<vmem>>, vector<1x128xf32>,
    %c3_i32 = arith.constant 3 : i32
    %87 = arith.index_cast %c3_i32 : i32 to index
    %c0_21 = arith.constant 0 : index
    %88 = vector.load %arg1[%87, %c0_21] : memref<8x384xf32, #tpu.memory_space<vmem>>, vector<1x384xf32>
    %89 = arith.truncf %84 : vector<1x128xf32> to vector<1x128xbf16>
    %cst_22 = arith.constant dense<0.000000e+00> : vector<1x384xf32>
    %90 = tpu.matmul %89, %3, %cst_22 {dimension_numbers = #tpu.dot_dimension_numbers<[1], [0], [0], [1], [0, 0, 1, 1], [], []>} : vector<1x128xbf16>, vector<128x384xbf16>, vector<1x384xf32> -> vector<1x384xf32>
    %91 = vector.extract_strided_slice %88 {offsets = [0, 0], sizes = [1, 256], strides = [1, 1]} : vector<1x384xf32> to vector<1x256xf32>
    %92 = vector.extract_strided_slice %90 {offsets = [0, 0], sizes = [1, 256], strides = [1, 1]} : vector<1x384xf32> to vector<1x256xf32>
    %93 = arith.addf %91, %92 : vector<1x256xf32>
    %94 = arith.negf %93 : vector<1x256xf32>
    %95 = math.exp %94 : vector<1x256xf32>
    %cst_23 = arith.constant 1.000000e+00 : f32
    %96 = vector.broadcast %cst_23 : f32 to vector<1x256xf32>
    %97 = arith.addf %96, %95 : vector<1x256xf32>
    %98 = arith.divf %96, %97 : vector<1x256xf32>
    %99 = vector.extract_strided_slice %98 {offsets = [0, 0], sizes = [1, 128], strides = [1, 1]} : vector<1x256xf32> to vector<1x128xf32>
    %100 = vector.extract_strided_slice %98 {offsets = [0, 128], sizes = [1, 128], strides = [1, 1]} : vector<1x256xf32> to vector<1x128xf32>
    %101 = vector.extract_strided_slice %88 {offsets = [0, 256], sizes = [1, 128], strides = [1, 1]} : vector<1x384xf32> to vector<1x128xf32>
    %102 = vector.extract_strided_slice %90 {offsets = [0, 256], sizes = [1, 128], strides = [1, 1]} : vector<1x384xf32> to vector<1x128xf32>
    %103 = arith.addf %102, %4 : vector<1x128xf32>
    %104 = arith.mulf %99, %103 : vector<1x128xf32>
    %105 = arith.addf %101, %104 : vector<1x128xf32>
    %106 = math.tanh %105 : vector<1x128xf32>
    %cst_24 = arith.constant 1.000000e+00 : f32
    %107 = vector.broadcast %cst_24 : f32 to vector<1x128xf32>
    %108 = arith.subf %107, %100 : vector<1x128xf32>
    %109 = arith.mulf %108, %106 : vector<1x128xf32>
    %110 = arith.mulf %100, %84 : vector<1x128xf32>
    %111 = arith.addf %109, %110 : vector<1x128xf32>
    %112 = arith.index_cast %c3_i32 : i32 to index
    %c0_25 = arith.constant 0 : index
    %113 = vector.load %arg5[%112, %c0_25] : memref<8x128xf32, #tpu.memory_space<vmem>>, vector<1x128xf32>
    tpu.vector_store %arg5[%112, %c0_25], %111 {strides = array<i32>} : memref<8x128xf32, #tpu.memory_space<vmem>>, vector<1x128xf32>,
    %c4_i32 = arith.constant 4 : i32
    %114 = arith.index_cast %c4_i32 : i32 to index
    %c0_26 = arith.constant 0 : index
    %115 = vector.load %arg1[%114, %c0_26] : memref<8x384xf32, #tpu.memory_space<vmem>>, vector<1x384xf32>
    %116 = arith.truncf %111 : vector<1x128xf32> to vector<1x128xbf16>
    %cst_27 = arith.constant dense<0.000000e+00> : vector<1x384xf32>
    %117 = tpu.matmul %116, %3, %cst_27 {dimension_numbers = #tpu.dot_dimension_numbers<[1], [0], [0], [1], [0, 0, 1, 1], [], []>} : vector<1x128xbf16>, vector<128x384xbf16>, vector<1x384xf32> -> vector<1x384xf32>
    %118 = vector.extract_strided_slice %115 {offsets = [0, 0], sizes = [1, 256], strides = [1, 1]} : vector<1x384xf32> to vector<1x256xf32>
    %119 = vector.extract_strided_slice %117 {offsets = [0, 0], sizes = [1, 256], strides = [1, 1]} : vector<1x384xf32> to vector<1x256xf32>
    %120 = arith.addf %118, %119 : vector<1x256xf32>
    %121 = arith.negf %120 : vector<1x256xf32>
    %122 = math.exp %121 : vector<1x256xf32>
    %cst_28 = arith.constant 1.000000e+00 : f32
    %123 = vector.broadcast %cst_28 : f32 to vector<1x256xf32>
    %124 = arith.addf %123, %122 : vector<1x256xf32>
    %125 = arith.divf %123, %124 : vector<1x256xf32>
    %126 = vector.extract_strided_slice %125 {offsets = [0, 0], sizes = [1, 128], strides = [1, 1]} : vector<1x256xf32> to vector<1x128xf32>
    %127 = vector.extract_strided_slice %125 {offsets = [0, 128], sizes = [1, 128], strides = [1, 1]} : vector<1x256xf32> to vector<1x128xf32>
    %128 = vector.extract_strided_slice %115 {offsets = [0, 256], sizes = [1, 128], strides = [1, 1]} : vector<1x384xf32> to vector<1x128xf32>
    %129 = vector.extract_strided_slice %117 {offsets = [0, 256], sizes = [1, 128], strides = [1, 1]} : vector<1x384xf32> to vector<1x128xf32>
    %130 = arith.addf %129, %4 : vector<1x128xf32>
    %131 = arith.mulf %126, %130 : vector<1x128xf32>
    %132 = arith.addf %128, %131 : vector<1x128xf32>
    %133 = math.tanh %132 : vector<1x128xf32>
    %cst_29 = arith.constant 1.000000e+00 : f32
    %134 = vector.broadcast %cst_29 : f32 to vector<1x128xf32>
    %135 = arith.subf %134, %127 : vector<1x128xf32>
    %136 = arith.mulf %135, %133 : vector<1x128xf32>
    %137 = arith.mulf %127, %111 : vector<1x128xf32>
    %138 = arith.addf %136, %137 : vector<1x128xf32>
    %139 = arith.index_cast %c4_i32 : i32 to index
    %c0_30 = arith.constant 0 : index
    %140 = vector.load %arg5[%139, %c0_30] : memref<8x128xf32, #tpu.memory_space<vmem>>, vector<1x128xf32>
    tpu.vector_store %arg5[%139, %c0_30], %138 {strides = array<i32>} : memref<8x128xf32, #tpu.memory_space<vmem>>, vector<1x128xf32>,
    %c5_i32 = arith.constant 5 : i32
    %141 = arith.index_cast %c5_i32 : i32 to index
    %c0_31 = arith.constant 0 : index
    %142 = vector.load %arg1[%141, %c0_31] : memref<8x384xf32, #tpu.memory_space<vmem>>, vector<1x384xf32>
    %143 = arith.truncf %138 : vector<1x128xf32> to vector<1x128xbf16>
    %cst_32 = arith.constant dense<0.000000e+00> : vector<1x384xf32>
    %144 = tpu.matmul %143, %3, %cst_32 {dimension_numbers = #tpu.dot_dimension_numbers<[1], [0], [0], [1], [0, 0, 1, 1], [], []>} : vector<1x128xbf16>, vector<128x384xbf16>, vector<1x384xf32> -> vector<1x384xf32>
    %145 = vector.extract_strided_slice %142 {offsets = [0, 0], sizes = [1, 256], strides = [1, 1]} : vector<1x384xf32> to vector<1x256xf32>
    %146 = vector.extract_strided_slice %144 {offsets = [0, 0], sizes = [1, 256], strides = [1, 1]} : vector<1x384xf32> to vector<1x256xf32>
    %147 = arith.addf %145, %146 : vector<1x256xf32>
    %148 = arith.negf %147 : vector<1x256xf32>
    %149 = math.exp %148 : vector<1x256xf32>
    %cst_33 = arith.constant 1.000000e+00 : f32
    %150 = vector.broadcast %cst_33 : f32 to vector<1x256xf32>
    %151 = arith.addf %150, %149 : vector<1x256xf32>
    %152 = arith.divf %150, %151 : vector<1x256xf32>
    %153 = vector.extract_strided_slice %152 {offsets = [0, 0], sizes = [1, 128], strides = [1, 1]} : vector<1x256xf32> to vector<1x128xf32>
    %154 = vector.extract_strided_slice %152 {offsets = [0, 128], sizes = [1, 128], strides = [1, 1]} : vector<1x256xf32> to vector<1x128xf32>
    %155 = vector.extract_strided_slice %142 {offsets = [0, 256], sizes = [1, 128], strides = [1, 1]} : vector<1x384xf32> to vector<1x128xf32>
    %156 = vector.extract_strided_slice %144 {offsets = [0, 256], sizes = [1, 128], strides = [1, 1]} : vector<1x384xf32> to vector<1x128xf32>
    %157 = arith.addf %156, %4 : vector<1x128xf32>
    %158 = arith.mulf %153, %157 : vector<1x128xf32>
    %159 = arith.addf %155, %158 : vector<1x128xf32>
    %160 = math.tanh %159 : vector<1x128xf32>
    %cst_34 = arith.constant 1.000000e+00 : f32
    %161 = vector.broadcast %cst_34 : f32 to vector<1x128xf32>
    %162 = arith.subf %161, %154 : vector<1x128xf32>
    %163 = arith.mulf %162, %160 : vector<1x128xf32>
    %164 = arith.mulf %154, %138 : vector<1x128xf32>
    %165 = arith.addf %163, %164 : vector<1x128xf32>
    %166 = arith.index_cast %c5_i32 : i32 to index
    %c0_35 = arith.constant 0 : index
    %167 = vector.load %arg5[%166, %c0_35] : memref<8x128xf32, #tpu.memory_space<vmem>>, vector<1x128xf32>
    tpu.vector_store %arg5[%166, %c0_35], %165 {strides = array<i32>} : memref<8x128xf32, #tpu.memory_space<vmem>>, vector<1x128xf32>,
    %c6_i32 = arith.constant 6 : i32
    %168 = arith.index_cast %c6_i32 : i32 to index
    %c0_36 = arith.constant 0 : index
    %169 = vector.load %arg1[%168, %c0_36] : memref<8x384xf32, #tpu.memory_space<vmem>>, vector<1x384xf32>
    %170 = arith.truncf %165 : vector<1x128xf32> to vector<1x128xbf16>
    %cst_37 = arith.constant dense<0.000000e+00> : vector<1x384xf32>
    %171 = tpu.matmul %170, %3, %cst_37 {dimension_numbers = #tpu.dot_dimension_numbers<[1], [0], [0], [1], [0, 0, 1, 1], [], []>} : vector<1x128xbf16>, vector<128x384xbf16>, vector<1x384xf32> -> vector<1x384xf32>
    %172 = vector.extract_strided_slice %169 {offsets = [0, 0], sizes = [1, 256], strides = [1, 1]} : vector<1x384xf32> to vector<1x256xf32>
    %173 = vector.extract_strided_slice %171 {offsets = [0, 0], sizes = [1, 256], strides = [1, 1]} : vector<1x384xf32> to vector<1x256xf32>
    %174 = arith.addf %172, %173 : vector<1x256xf32>
    %175 = arith.negf %174 : vector<1x256xf32>
    %176 = math.exp %175 : vector<1x256xf32>
    %cst_38 = arith.constant 1.000000e+00 : f32
    %177 = vector.broadcast %cst_38 : f32 to vector<1x256xf32>
    %178 = arith.addf %177, %176 : vector<1x256xf32>
    %179 = arith.divf %177, %178 : vector<1x256xf32>
    %180 = vector.extract_strided_slice %179 {offsets = [0, 0], sizes = [1, 128], strides = [1, 1]} : vector<1x256xf32> to vector<1x128xf32>
    %181 = vector.extract_strided_slice %179 {offsets = [0, 128], sizes = [1, 128], strides = [1, 1]} : vector<1x256xf32> to vector<1x128xf32>
    %182 = vector.extract_strided_slice %169 {offsets = [0, 256], sizes = [1, 128], strides = [1, 1]} : vector<1x384xf32> to vector<1x128xf32>
    %183 = vector.extract_strided_slice %171 {offsets = [0, 256], sizes = [1, 128], strides = [1, 1]} : vector<1x384xf32> to vector<1x128xf32>
    %184 = arith.addf %183, %4 : vector<1x128xf32>
    %185 = arith.mulf %180, %184 : vector<1x128xf32>
    %186 = arith.addf %182, %185 : vector<1x128xf32>
    %187 = math.tanh %186 : vector<1x128xf32>
    %cst_39 = arith.constant 1.000000e+00 : f32
    %188 = vector.broadcast %cst_39 : f32 to vector<1x128xf32>
    %189 = arith.subf %188, %181 : vector<1x128xf32>
    %190 = arith.mulf %189, %187 : vector<1x128xf32>
    %191 = arith.mulf %181, %165 : vector<1x128xf32>
    %192 = arith.addf %190, %191 : vector<1x128xf32>
    %193 = arith.index_cast %c6_i32 : i32 to index
    %c0_40 = arith.constant 0 : index
    %194 = vector.load %arg5[%193, %c0_40] : memref<8x128xf32, #tpu.memory_space<vmem>>, vector<1x128xf32>
    tpu.vector_store %arg5[%193, %c0_40], %192 {strides = array<i32>} : memref<8x128xf32, #tpu.memory_space<vmem>>, vector<1x128xf32>,
    %c7_i32 = arith.constant 7 : i32
    %195 = arith.index_cast %c7_i32 : i32 to index
    %c0_41 = arith.constant 0 : index
    %196 = vector.load %arg1[%195, %c0_41] : memref<8x384xf32, #tpu.memory_space<vmem>>, vector<1x384xf32>
    %197 = arith.truncf %192 : vector<1x128xf32> to vector<1x128xbf16>
    %cst_42 = arith.constant dense<0.000000e+00> : vector<1x384xf32>
    %198 = tpu.matmul %197, %3, %cst_42 {dimension_numbers = #tpu.dot_dimension_numbers<[1], [0], [0], [1], [0, 0, 1, 1], [], []>} : vector<1x128xbf16>, vector<128x384xbf16>, vector<1x384xf32> -> vector<1x384xf32>
    %199 = vector.extract_strided_slice %196 {offsets = [0, 0], sizes = [1, 256], strides = [1, 1]} : vector<1x384xf32> to vector<1x256xf32>
    %200 = vector.extract_strided_slice %198 {offsets = [0, 0], sizes = [1, 256], strides = [1, 1]} : vector<1x384xf32> to vector<1x256xf32>
    %201 = arith.addf %199, %200 : vector<1x256xf32>
    %202 = arith.negf %201 : vector<1x256xf32>
    %203 = math.exp %202 : vector<1x256xf32>
    %cst_43 = arith.constant 1.000000e+00 : f32
    %204 = vector.broadcast %cst_43 : f32 to vector<1x256xf32>
    %205 = arith.addf %204, %203 : vector<1x256xf32>
    %206 = arith.divf %204, %205 : vector<1x256xf32>
    %207 = vector.extract_strided_slice %206 {offsets = [0, 0], sizes = [1, 128], strides = [1, 1]} : vector<1x256xf32> to vector<1x128xf32>
    %208 = vector.extract_strided_slice %206 {offsets = [0, 128], sizes = [1, 128], strides = [1, 1]} : vector<1x256xf32> to vector<1x128xf32>
    %209 = vector.extract_strided_slice %196 {offsets = [0, 256], sizes = [1, 128], strides = [1, 1]} : vector<1x384xf32> to vector<1x128xf32>
    %210 = vector.extract_strided_slice %198 {offsets = [0, 256], sizes = [1, 128], strides = [1, 1]} : vector<1x384xf32> to vector<1x128xf32>
    %211 = arith.addf %210, %4 : vector<1x128xf32>
    %212 = arith.mulf %207, %211 : vector<1x128xf32>
    %213 = arith.addf %209, %212 : vector<1x128xf32>
    %214 = math.tanh %213 : vector<1x128xf32>
    %cst_44 = arith.constant 1.000000e+00 : f32
    %215 = vector.broadcast %cst_44 : f32 to vector<1x128xf32>
    %216 = arith.subf %215, %208 : vector<1x128xf32>
    %217 = arith.mulf %216, %214 : vector<1x128xf32>
    %218 = arith.mulf %208, %192 : vector<1x128xf32>
    %219 = arith.addf %217, %218 : vector<1x128xf32>
    %220 = arith.index_cast %c7_i32 : i32 to index
    %c0_45 = arith.constant 0 : index
    %221 = vector.load %arg5[%220, %c0_45] : memref<8x128xf32, #tpu.memory_space<vmem>>, vector<1x128xf32>
    tpu.vector_store %arg5[%220, %c0_45], %219 {strides = array<i32>} : memref<8x128xf32, #tpu.memory_space<vmem>>, vector<1x128xf32>,
    %c8_i32 = arith.constant 8 : i32
    %c0_46 = arith.constant 0 : index
    %c0_47 = arith.constant 0 : index
    %222 = vector.load %arg7[%c0_46, %c0_47] : memref<1x128xf32, #tpu.memory_space<vmem>>, vector<1x128xf32>
    tpu.vector_store %arg7[%c0_46, %c0_47], %219 {strides = array<i32>} : memref<1x128xf32, #tpu.memory_space<vmem>>, vector<1x128xf32>,
    return
  }
  func.func @transform_0(%arg0: i32) -> (i32, i32) {
    %c0_i32 = arith.constant 0 : i32
    %c0_i32_0 = arith.constant 0 : i32
    return %arg0, %c0_i32 : i32, i32
  }
  func.func @transform_1(%arg0: i32) -> (i32, i32) {
    %c0_i32 = arith.constant 0 : i32
    %c0_i32_0 = arith.constant 0 : i32
    %c0_i32_1 = arith.constant 0 : i32
    return %c0_i32, %c0_i32_0 : i32, i32
  }
  func.func @transform_3(%arg0: i32) -> (i32, i32) {
    %c0_i32 = arith.constant 0 : i32
    %c0_i32_0 = arith.constant 0 : i32
    %c0_i32_1 = arith.constant 0 : i32
    return %c0_i32, %c0_i32_0 : i32, i32
  }
  func.func @transform_4(%arg0: i32) -> (i32, i32) {
    %c0_i32 = arith.constant 0 : i32
    %c0_i32_0 = arith.constant 0 : i32
    return %arg0, %c0_i32 : i32, i32
  }
}

</mosaic_0001>

<bundles_post_ra>
// kernel: tpu_custom_call.1
= control target key start
LH: loop header
LB: loop body
LE: loop exit
PB: predicated region body
PF: predicated region fallthrough
CT: control target
= control target key end

     0   :  { %9 = vsyncpa [#allocation6], 0  ;;  %s1941_s0 = inlined_call_operand.hbm [shape: f32[8,384], index: 0, kind: input, shape index: {}]   ;;  %s1942_s1 = inlined_call_operand.vmem [shape: f32[1,128], index: 1, kind: input, shape index: {}]   ;;  %s1943_s2 = inlined_call_operand.hbm [shape: bf16[128,384], index: 2, kind: input, shape index: {}]   ;;  %s1944_s3 = inlined_call_operand.vmem [shape: f32[1,128], index: 3, kind: input, shape index: {}]   ;;  %s1945_s4 = inlined_call_operand.hbm [shape: f32[8,128], index: 4, kind: output, shape index: {}]  }
   0x1   :  { %10 = vsyncpa [#allocation7], 0  ;;  %s1470_s15 = smov [#allocation5]   ;;  %s1420_s19 = scalar_lea.hbm %s1941_s0, 384 }
   0x2   :  { %s17_s16 = sshll.u32 %s1470_s15, 4  ;;  %p1421_p0 = scmp.ne.s32.totalorder %s1941_s0, %s1420_s19  ;;  %s18_s16 = int_to_ptr.vmem [resolvable:$true] %s17_s16 }
   0x3   :  { %p1424_p1 = scmp.lt.u32.totalorder %s1420_s19, %s1941_s0 }
   0x5   :  { %p1426_p2 = pnand %p1424_p1, %p1421_p0 }
   0x7   :  { %1429 = shalt.err (!%p1426_p2)
}
   0x8   :  { %s1430_s24 = scalar_lea.vmem %s18_s16, 384  ;;  %p1435_p4 = scmp.lt.s32.totalorder %s18_s16, %s18_s16 }
   0x9   :  { %p1431_p3 = scmp.ne.s32.totalorder %s18_s16, %s1430_s24  ;;  %p1436_p5 = scmp.lt.s32.totalorder %s1430_s24, %s1430_s24 }
   0xb   :  { %p1437_p6 = por %p1436_p5, %p1435_p4 }
   0xd   :  { %p1438_p7 = pnand %p1437_p6, %p1431_p3 }
   0xf   :  { %1441 = shalt.err (!%p1438_p7)
}
  0x10   :  { %20 = dma.hbm_to_vmem [thread:$0]  %s1941_s0, 384, %s18_s16, [#allocation6]  }
  0x11   :  { %1464 = dma.done.wait [#allocation6], 384  }
  0x12   :  { %1465 = vsyncadd [#allocation6], 4294966912 }
  0x13   :  { %s37_s27 = sld [smem:[#allocation0]]   ;;  %s1471_s28 = smov [#allocation2]  }
  0x14   :  { %s45_s29 = sshll.u32 %s1471_s28, 4  ;;  %s1472_s30 = smov 384   ;;  %s46_s29 = int_to_ptr.vmem [resolvable:$true] %s45_s29 }
  0x15   :  { %49 = sst [smem:[#allocation10]] %s1472_s30  ;;  %s1473_s5 = smov 3  }
  0x16   :  { %51 = sst [smem:[#allocation10 + $0x1]] %s1472_s30  ;;  %s1474_s6 = smov 64  }
  0x17   :  { %53 = sst [smem:[#allocation10 + $0x2]] %s1473_s5  ;;  %s1475_s8 = smov 128  }
  0x18   :  { %55 = sst [smem:[#allocation10 + $0x3]] %s1474_s6  ;;  %s1476_s10 = smov 2  }
  0x19   :  { %s1113_s7 = sshll.u32 %s37_s27, 26  ;;  %57 = sst [smem:[#allocation10 + $0x4]] %s1475_s8 }
  0x1a   :  { %s1114_s9 = sadd.s32 134217728, %s1113_s7  ;;  %59 = sst [smem:[#allocation10 + $0x5]] %s1476_s10 }
  0x1b   :  { %s1477_s0 = smov 192   ;;  %63 = sst [smem:[#allocation10 + $0x7]] %s1474_s6 }
  0x1c   :  { %61 = sst [smem:[#allocation10 + $0x6]] %s1477_s0  ;;  %s1478_s11 = smov 4  }
  0x1d   :  { %65 = sst [smem:[#allocation10 + $0x8]] %s1478_s11  ;;  %s1479_s12 = smov [#allocation4]  }
  0x1e   :  { %s1480_s13 = smov [#allocation9]  }
  0x1f   :  { %67 = dma.general %s1943_s2, 3072, %s46_s29, %s1479_s12, %s1480_s13, [#allocation10], %s1114_s9, 0  }
  0x20   :  { %1466 = dma.done.wait [#allocation4], 3072 }
  0x21   :  { %1467 = vsyncadd [#allocation4], 4294964224  ;;  %v72_v0 = vld [vmem:[%s1942_s1] sm:$0x1]  ;;  %v1529_v1 = vld [vmem:[#allocation2 + $0x8] sm:$0xff]  ;;  %v1481_v4 = vmov 0.0   ;;  %v189_v31 = vlaneseq }
  0x22   :  { %73 = vst [vmem:[#allocation3] sm:$0x1] %v72_v0  ;;  %v1531_v2 = vld [vmem:[#allocation2] sm:$0xff]  ;;  %102 = vmatprep.subr.bf16.mxu0 %v1529_v1  ;;  %1196 = vmatprep.subr.bf16.mxu1 %v1481_v4  ;;  %v1482_v5 = vmov 0   ;;  %v1540_v6 = vld [vmem:[#allocation2 + $0x18] sm:$0xff]  ;;  %vm1483_vm0 = vmmov 0  }
  0x23   :  { %v1533_v3 = vld [vmem:[#allocation2 + $0x20] sm:$0xff]  ;;  %103 = vmatpush1.bf16.msra.mxu0 %v1531_v2  ;;  %134 = vmatprep.mubr.bf16.mxu0 %v1482_v5  ;;  %v1544_v7 = vld [vmem:[#allocation2 + $0x38] sm:$0xff]  ;;  %v1546_v8 = vld [vmem:[#allocation2 + $0x10] sm:$0xff]  ;;  %v1484_v29 = vmov 1966171168   ;;  %v190_v33 = vshrl.u32 %v189_v31, 7 }
  0x24   :  { %104 = vmatprep.subr.bf16.mxu0 %v1533_v3  ;;  %1212 = vmatprep.mubr.msk.bf16.mxu1 %vm1483_vm0, %v1481_v4  ;;  %v1551_v9 = vld [vmem:[#allocation2 + $0x30] sm:$0xff]  ;;  %v1554_v10 = vld [vmem:[#allocation2 + $0x28] sm:$0xff]  ;;  %v1564_v13 = vld [vmem:[#allocation2 + $0x40] sm:$0xff]  ;;  %v187_v30 = vunpack.c.l.s4 %v1484_v29 }
  0x25   :  { %1197 = vmatpush3.bf16.msra.mxu1 %v1546_v8  ;;  %v1556_v11 = vld [vmem:[#allocation2 + $0x50] sm:$0xff]  ;;  %v1561_v12 = vld [vmem:[#allocation2 + $0x48] sm:$0xff]  ;;  %v1571_v15 = vld [vmem:[#allocation2 + $0x60] sm:$0xff] }
  0x26   :  { %1198 = vmatprep.subr.bf16.mxu1 %v1481_v4  ;;  %v1566_v14 = vld [vmem:[#allocation2 + $0x68] sm:$0xff]  ;;  %v1574_v16 = vld [vmem:[#allocation2 + $0x58] sm:$0xff]  ;;  %v1576_v17 = vld [vmem:[#allocation2 + $0x80] sm:$0xff]  ;;  %v188_v32 = vunpack.c.0.s8 %v187_v30 }
  0x27   :  { %105 = vmatpush1.bf16.msra.mxu0 %v1540_v6  ;;  %v1581_v18 = vld [vmem:[#allocation2 + $0x78] sm:$0xff]  ;;  %v1584_v19 = vld [vmem:[#allocation2 + $0x70] sm:$0xff]  ;;  %v1594_v22 = vld [vmem:[#allocation2 + $0x88] sm:$0xff] }
  0x28   :  { %106 = vmatprep.subr.bf16.mxu0 %v1544_v7  ;;  %v1586_v20 = vld [vmem:[#allocation2 + $0x98] sm:$0xff]  ;;  %v1591_v21 = vld [vmem:[#allocation2 + $0x90] sm:$0xff]  ;;  %v1603_v25 = vld [vmem:[#allocation2 + $0xa8] sm:$0xff]  ;;  %v1653_v35 = vsub.s32 %v188_v32, %v190_v33 }
  0x29   :  { %1199 = vmatpush3.bf16.msra.mxu1 %v1554_v10  ;;  %v1596_v23 = vld [vmem:[#allocation2 + $0xb0] sm:$0xff]  ;;  %v1599_v24 = vld [vmem:[#allocation3] sm:$0x1]  ;;  %v1613_v28 = vld [vmem:[#allocation2 + $0xb8] sm:$0xff] }
  0x2a   :  { %1200 = vmatprep.subr.bf16.mxu1 %v1481_v4  ;;  %v1606_v26 = vld [vmem:[#allocation2 + $0xa0] sm:$0xff]  ;;  %v101_v27 = vpack.c.bf16 %v1599_v24, %v1599_v24 }
  0x2b   :  { %107 = vmatpush1.bf16.msra.mxu0 %v1551_v9  ;;  %v100_v42 = vld [vmem:[#allocation5] ss:$8 sm:$0x7]  ;;  %v1660_v51 = vld [vmem:[%s1944_s3] sm:$0x1]  ;;  %s1485_s3 = smov [#allocation8]  }
  0x2c   :  { %108 = vmatprep.subr.bf16.mxu0 %v1556_v11  ;;  %v211_v53 = vrot.slane %v100_v42, 2  ;;  %s1098_s18 = sshll.u32 %s1485_s3, 4  ;;  %s1099_s18 = int_to_ptr.vmem [resolvable:$true] %s1098_s18 }
  0x2d   :  { %1201 = vmatpush3.bf16.msra.mxu1 %v1564_v13  ;;  %s1442_s19 = scalar_lea.vmem %s1099_s18, 128  ;;  %p1447_p9 = scmp.lt.s32.totalorder %s1099_s18, %s1099_s18 }
  0x2e   :  { %1202 = vmatprep.subr.bf16.mxu1 %v1481_v4  ;;  %p1443_p8 = scmp.ne.s32.totalorder %s1099_s18, %s1442_s19  ;;  %p1448_p10 = scmp.lt.s32.totalorder %s1442_s19, %s1442_s19 }
  0x2f   :  { %109 = vmatpush1.bf16.msra.mxu0 %v1561_v12 }
  0x30   :  { %110 = vmatprep.subr.bf16.mxu0 %v1566_v14  ;;  %p1449_p11 = por %p1448_p10, %p1447_p9 }
  0x31   :  { %1203 = vmatpush3.bf16.msra.mxu1 %v1574_v16 }
  0x32   :  { %1204 = vmatprep.subr.bf16.mxu1 %v1481_v4  ;;  %p1450_p12 = pnand %p1449_p11, %p1443_p8 }
  0x33   :  { %111 = vmatpush1.bf16.msra.mxu0 %v1571_v15 }
  0x34   :  { %112 = vmatprep.subr.bf16.mxu0 %v1576_v17 }
  0x35   :  { %1205 = vmatpush3.bf16.msra.mxu1 %v1584_v19 }
  0x36   :  { %1206 = vmatprep.subr.bf16.mxu1 %v1481_v4 }
  0x37   :  { %113 = vmatpush1.bf16.msra.mxu0 %v1581_v18 }
  0x38   :  { %114 = vmatprep.subr.bf16.mxu0 %v1586_v20 }
  0x39   :  { %1207 = vmatpush3.bf16.msra.mxu1 %v1594_v22 }
  0x3a   :  { %1208 = vmatprep.subr.bf16.mxu1 %v1481_v4 }
  0x3b   :  { %115 = vmatpush1.bf16.msra.mxu0 %v1591_v21 }
  0x3c   :  { %116 = vmatprep.subr.bf16.mxu0 %v1596_v23 }
  0x3d   :  { %1209 = vmatpush3.bf16.msra.mxu1 %v1606_v26 }
  0x3e   :  { %1210 = vmatprep.subr.bf16.mxu1 %v1481_v4 }
  0x3f   :  { %117 = vmatpush1.bf16.msra.mxu0 %v1603_v25 }
  0x40   :  { %226 = vmatprep.subr.bf16.mxu0 %v1529_v1 }
  0x41   :  { %1211 = vmatpush3.bf16.msra.mxu1 %v1613_v28 }
  0x42   :  { %135 = vmatmul.mubr.bf16.vlgmr.msra.gmra.mrb[0].mxu0 %v101_v27  ;;  %1216 = vmatprep.subr.bf16.mxu1 %v1481_v4 }
  0x43   :  { %227 = vmatpush1.bf16.msra.mxu0 %v1531_v2  ;;  %258 = vmatprep.mubr.bf16.mxu0 %v1482_v5 }
  0x44   :  { %228 = vmatprep.subr.bf16.mxu0 %v1533_v3  ;;  %1213 = vmatmul.mubr.bf16.vlgmr.msra.gmra.mrb[0].mxu1 %v101_v27 }
  0x45   :  { %1217 = vmatpush3.bf16.msra.mxu1 %v1546_v8  ;;  %1232 = vmatprep.mubr.msk.bf16.mxu1 %vm1483_vm0, %v1481_v4 }
  0x46   :  { %1218 = vmatprep.subr.bf16.mxu1 %v1481_v4 }
  0x47   :  { %229 = vmatpush1.bf16.msra.mxu0 %v1540_v6 }
  0x48   :  { %230 = vmatprep.subr.bf16.mxu0 %v1544_v7 }
  0x49   :  { %1219 = vmatpush3.bf16.msra.mxu1 %v1554_v10 }
  0x4a   :  { %1220 = vmatprep.subr.bf16.mxu1 %v1481_v4 }
  0x4b   :  { %231 = vmatpush1.bf16.msra.mxu0 %v1551_v9 }
  0x4c   :  { %232 = vmatprep.subr.bf16.mxu0 %v1556_v11 }
  0x4d   :  { %1221 = vmatpush3.bf16.msra.mxu1 %v1564_v13 }
  0x4e   :  { %1222 = vmatprep.subr.bf16.mxu1 %v1481_v4 }
  0x4f   :  { %233 = vmatpush1.bf16.msra.mxu0 %v1561_v12 }
  0x50   :  { %234 = vmatprep.subr.bf16.mxu0 %v1566_v14 }
  0x51   :  { %1223 = vmatpush3.bf16.msra.mxu1 %v1574_v16 }
  0x52   :  { %1224 = vmatprep.subr.bf16.mxu1 %v1481_v4 }
  0x53   :  { %235 = vmatpush1.bf16.msra.mxu0 %v1571_v15 }
  0x54   :  { %236 = vmatprep.subr.bf16.mxu0 %v1576_v17 }
  0x55   :  { %1225 = vmatpush3.bf16.msra.mxu1 %v1584_v19 }
  0x56   :  { %1226 = vmatprep.subr.bf16.mxu1 %v1481_v4 }
  0x57   :  { %237 = vmatpush1.bf16.msra.mxu0 %v1581_v18 }
  0x58   :  { %238 = vmatprep.subr.bf16.mxu0 %v1586_v20 }
  0x59   :  { %1227 = vmatpush3.bf16.msra.mxu1 %v1594_v22 }
  0x5a   :  { %1228 = vmatprep.subr.bf16.mxu1 %v1481_v4 }
  0x5b   :  { %239 = vmatpush1.bf16.msra.mxu0 %v1591_v21 }
  0x5c   :  { %240 = vmatprep.subr.bf16.mxu0 %v1596_v23 }
  0x5d   :  { %1229 = vmatpush3.bf16.msra.mxu1 %v1606_v26 }
  0x5e   :  { %1230 = vmatprep.subr.bf16.mxu1 %v1481_v4 }
  0x5f   :  { %241 = vmatpush1.bf16.msra.mxu0 %v1603_v25 }
  0x60   :  { %350 = vmatprep.subr.bf16.mxu0 %v1529_v1 }
  0x61   :  { %1231 = vmatpush3.bf16.msra.mxu1 %v1613_v28 }
  0x62   :  { %1236 = vmatprep.subr.bf16.mxu1 %v1481_v4 }
 0x115   :  { %v136_v34 = vpop.f32.mrb[0].mxu0 }
 0x116   :  { %v138_v36 = vpop.f32.mrb[1].mxu0 }
 0x117   :  { %v185_v37 = vcombine.low %v136_v34, %v138_v36  ;;  %v140_v38 = vpop.f32.mrb[2].mxu0  ;;  %v177_v41 = vpop.f32.mrb[0].mxu1 }
 0x118   :  { %v141_v39 = vpop.f32.mrb[3].mxu0  ;;  %v1214_v43 = vpop.f32.mrb[1].mxu1  ;;  %v208_v52 = vadd.f32 %v177_v41, %v1660_v51 }
 0x119   :  { %v192_v40 = vrot.slane %v185_v37, %v1653_v35  ;;  %v180_v45 = vpop.f32.mrb[2].mxu1  ;;  %v224_v37 = vld [vmem:[#allocation5 + $0x1] ss:$8 sm:$0x7] }
 0x11a   :  { %v1215_v46 = vpop.f32.mrb[3].mxu1 }
 0x11b   :  { %v199_v44 = vrot.slane %v192_v40, %v1653_v35 }
 0x11d   :  { %v201_v47 = vadd.f32 %v199_v44, %v100_v42  ;;  %v335_v44 = vrot.slane %v224_v37, 2 }
 0x11f   :  { %v1115_v48 = vmul.f32 -1.442695, %v201_v47 }
 0x121   :  { %1372 = vpow2.f32 %v1115_v48 }
 0x12b   :  { %v1373_v49 = vpop.eup %1372 }
 0x12c   :  { %v205_v50 = vadd.f32 1.0, %v1373_v49 }
 0x12e   :  { %1374 = vrcp.f32 %v205_v50 }
 0x138   :  { %v1375_v54 = vpop.eup %1374 }
 0x139   :  { %v209_v55 = vmul.f32 %v1375_v54, %v208_v52  ;;  %v216_v57 = vrot.slane %v1375_v54, 1 }
 0x13b   :  { %v213_v56 = vadd.f32 %v211_v53, %v209_v55  ;;  %v218_v58 = vsub.f32 1.0, %v216_v57  ;;  %v220_v61 = vmul.f32 %v216_v57, %v1599_v24 }
 0x13d   :  { %1376 = vtanh.f32 %v213_v56 }
 0x147   :  { %v1377_v59 = vpop.eup %1376 }
 0x148   :  { %v219_v60 = vmul.f32 %v1377_v59, %v218_v58 }
 0x14a   :  { %v1664_v62 = vadd.f32 %v220_v61, %v219_v60 }
 0x14c   :  { %222 = vst [vmem:[#allocation8] sm:$0x1] %v1664_v62  ;;  %v225_v63 = vpack.c.bf16 %v1664_v62, %v1664_v62 }
 0x14e   :  { %259 = vmatmul.mubr.bf16.vlgmr.msra.gmra.mrb[4].mxu0 %v225_v63  ;;  %1233 = vmatmul.mubr.bf16.vlgmr.msra.gmra.mrb[4].mxu1 %v225_v63 }
 0x14f   :  { %351 = vmatpush1.bf16.msra.mxu0 %v1531_v2  ;;  %1237 = vmatpush3.bf16.msra.mxu1 %v1546_v8 }
 0x150   :  { %352 = vmatprep.subr.bf16.mxu0 %v1533_v3  ;;  %1238 = vmatprep.subr.bf16.mxu1 %v1481_v4 }
 0x151   :  { %382 = vmatprep.mubr.bf16.mxu0 %v1482_v5  ;;  %1252 = vmatprep.mubr.msk.bf16.mxu1 %vm1483_vm0, %v1481_v4 }
 0x153   :  { %353 = vmatpush1.bf16.msra.mxu0 %v1540_v6  ;;  %1239 = vmatpush3.bf16.msra.mxu1 %v1554_v10 }
 0x154   :  { %354 = vmatprep.subr.bf16.mxu0 %v1544_v7  ;;  %1240 = vmatprep.subr.bf16.mxu1 %v1481_v4 }
 0x157   :  { %355 = vmatpush1.bf16.msra.mxu0 %v1551_v9  ;;  %1241 = vmatpush3.bf16.msra.mxu1 %v1564_v13 }
 0x158   :  { %356 = vmatprep.subr.bf16.mxu0 %v1556_v11  ;;  %1242 = vmatprep.subr.bf16.mxu1 %v1481_v4 }
 0x15b   :  { %357 = vmatpush1.bf16.msra.mxu0 %v1561_v12  ;;  %1243 = vmatpush3.bf16.msra.mxu1 %v1574_v16 }
 0x15c   :  { %358 = vmatprep.subr.bf16.mxu0 %v1566_v14  ;;  %1244 = vmatprep.subr.bf16.mxu1 %v1481_v4 }
 0x15f   :  { %359 = vmatpush1.bf16.msra.mxu0 %v1571_v15  ;;  %1245 = vmatpush3.bf16.msra.mxu1 %v1584_v19 }
 0x160   :  { %360 = vmatprep.subr.bf16.mxu0 %v1576_v17  ;;  %1246 = vmatprep.subr.bf16.mxu1 %v1481_v4 }
 0x163   :  { %361 = vmatpush1.bf16.msra.mxu0 %v1581_v18  ;;  %1247 = vmatpush3.bf16.msra.mxu1 %v1594_v22 }
 0x164   :  { %362 = vmatprep.subr.bf16.mxu0 %v1586_v20  ;;  %1248 = vmatprep.subr.bf16.mxu1 %v1481_v4 }
 0x167   :  { %363 = vmatpush1.bf16.msra.mxu0 %v1591_v21  ;;  %1249 = vmatpush3.bf16.msra.mxu1 %v1606_v26 }
 0x168   :  { %364 = vmatprep.subr.bf16.mxu0 %v1596_v23  ;;  %1250 = vmatprep.subr.bf16.mxu1 %v1481_v4 }
 0x16b   :  { %365 = vmatpush1.bf16.msra.mxu0 %v1603_v25  ;;  %1251 = vmatpush3.bf16.msra.mxu1 %v1613_v28 }
 0x16c   :  { %474 = vmatprep.subr.bf16.mxu0 %v1529_v1  ;;  %1256 = vmatprep.subr.bf16.mxu1 %v1481_v4 }
 0x221   :  { %v260_v0 = vpop.f32.mrb[4].mxu0  ;;  %v301_v24 = vpop.f32.mrb[4].mxu1 }
 0x222   :  { %v262_v27 = vpop.f32.mrb[5].mxu0  ;;  %v1234_v29 = vpop.f32.mrb[5].mxu1  ;;  %v332_v43 = vadd.f32 %v301_v24, %v1660_v51 }
 0x223   :  { %v309_v30 = vcombine.low %v260_v0, %v262_v27  ;;  %v264_v31 = vpop.f32.mrb[6].mxu0  ;;  %v304_v32 = vpop.f32.mrb[6].mxu1  ;;  %v348_v27 = vld [vmem:[#allocation5 + $0x2] ss:$8 sm:$0x7] }
 0x224   :  { %v265_v33 = vpop.f32.mrb[7].mxu0  ;;  %v1235_v34 = vpop.f32.mrb[7].mxu1 }
 0x225   :  { %v316_v36 = vrot.slane %v309_v30, %v1653_v35 }
 0x227   :  { %v323_v38 = vrot.slane %v316_v36, %v1653_v35  ;;  %v459_v36 = vrot.slane %v348_v27, 2 }
 0x229   :  { %v325_v39 = vadd.f32 %v323_v38, %v224_v37 }
 0x22b   :  { %v1116_v40 = vmul.f32 -1.442695, %v325_v39 }
 0x22d   :  { %1378 = vpow2.f32 %v1116_v40 }
 0x237   :  { %v1379_v41 = vpop.eup %1378 }
 0x238   :  { %v329_v42 = vadd.f32 1.0, %v1379_v41 }
 0x23a   :  { %1380 = vrcp.f32 %v329_v42 }
 0x244   :  { %v1381_v45 = vpop.eup %1380 }
 0x245   :  { %v333_v46 = vmul.f32 %v1381_v45, %v332_v43  ;;  %v340_v48 = vrot.slane %v1381_v45, 1 }
 0x247   :  { %v337_v47 = vadd.f32 %v335_v44, %v333_v46  ;;  %v342_v49 = vsub.f32 1.0, %v340_v48  ;;  %v344_v53 = vmul.f32 %v340_v48, %v1664_v62 }
 0x249   :  { %1382 = vtanh.f32 %v337_v47 }
 0x253   :  { %v1383_v50 = vpop.eup %1382 }
 0x254   :  { %v343_v52 = vmul.f32 %v1383_v50, %v342_v49 }
 0x256   :  { %v1708_v54 = vadd.f32 %v344_v53, %v343_v52 }
 0x258   :  { %346 = vst [vmem:[#allocation8 + $0x1] sm:$0x1] %v1708_v54  ;;  %v349_v55 = vpack.c.bf16 %v1708_v54, %v1708_v54 }
 0x25a   :  { %383 = vmatmul.mubr.bf16.vlgmr.msra.gmra.mrb[8].mxu0 %v349_v55  ;;  %1253 = vmatmul.mubr.bf16.vlgmr.msra.gmra.mrb[8].mxu1 %v349_v55 }
 0x25b   :  { %475 = vmatpush1.bf16.msra.mxu0 %v1531_v2  ;;  %1257 = vmatpush3.bf16.msra.mxu1 %v1546_v8 }
 0x25c   :  { %476 = vmatprep.subr.bf16.mxu0 %v1533_v3  ;;  %1258 = vmatprep.subr.bf16.mxu1 %v1481_v4 }
 0x25d   :  { %506 = vmatprep.mubr.bf16.mxu0 %v1482_v5  ;;  %1272 = vmatprep.mubr.msk.bf16.mxu1 %vm1483_vm0, %v1481_v4 }
 0x25f   :  { %477 = vmatpush1.bf16.msra.mxu0 %v1540_v6  ;;  %1259 = vmatpush3.bf16.msra.mxu1 %v1554_v10 }
 0x260   :  { %478 = vmatprep.subr.bf16.mxu0 %v1544_v7  ;;  %1260 = vmatprep.subr.bf16.mxu1 %v1481_v4 }
 0x263   :  { %479 = vmatpush1.bf16.msra.mxu0 %v1551_v9  ;;  %1261 = vmatpush3.bf16.msra.mxu1 %v1564_v13 }
 0x264   :  { %480 = vmatprep.subr.bf16.mxu0 %v1556_v11  ;;  %1262 = vmatprep.subr.bf16.mxu1 %v1481_v4 }
 0x267   :  { %481 = vmatpush1.bf16.msra.mxu0 %v1561_v12  ;;  %1263 = vmatpush3.bf16.msra.mxu1 %v1574_v16 }
 0x268   :  { %482 = vmatprep.subr.bf16.mxu0 %v1566_v14  ;;  %1264 = vmatprep.subr.bf16.mxu1 %v1481_v4 }
 0x26b   :  { %483 = vmatpush1.bf16.msra.mxu0 %v1571_v15  ;;  %1265 = vmatpush3.bf16.msra.mxu1 %v1584_v19 }
 0x26c   :  { %484 = vmatprep.subr.bf16.mxu0 %v1576_v17  ;;  %1266 = vmatprep.subr.bf16.mxu1 %v1481_v4 }
 0x26f   :  { %485 = vmatpush1.bf16.msra.mxu0 %v1581_v18  ;;  %1267 = vmatpush3.bf16.msra.mxu1 %v1594_v22 }
 0x270   :  { %486 = vmatprep.subr.bf16.mxu0 %v1586_v20  ;;  %1268 = vmatprep.subr.bf16.mxu1 %v1481_v4 }
 0x273   :  { %487 = vmatpush1.bf16.msra.mxu0 %v1591_v21  ;;  %1269 = vmatpush3.bf16.msra.mxu1 %v1606_v26 }
 0x274   :  { %488 = vmatprep.subr.bf16.mxu0 %v1596_v23  ;;  %1270 = vmatprep.subr.bf16.mxu1 %v1481_v4 }
 0x277   :  { %489 = vmatpush1.bf16.msra.mxu0 %v1603_v25  ;;  %1271 = vmatpush3.bf16.msra.mxu1 %v1613_v28 }
 0x278   :  { %598 = vmatprep.subr.bf16.mxu0 %v1529_v1  ;;  %1276 = vmatprep.subr.bf16.mxu1 %v1481_v4 }
 0x32d   :  { %v384_v56 = vpop.f32.mrb[8].mxu0  ;;  %v425_v57 = vpop.f32.mrb[8].mxu1 }
 0x32e   :  { %v386_v58 = vpop.f32.mrb[9].mxu0  ;;  %v1254_v59 = vpop.f32.mrb[9].mxu1  ;;  %v456_v34 = vadd.f32 %v425_v57, %v1660_v51 }
 0x32f   :  { %v433_v60 = vcombine.low %v384_v56, %v386_v58  ;;  %v388_v61 = vpop.f32.mrb[10].mxu0  ;;  %v428_v62 = vpop.f32.mrb[10].mxu1  ;;  %v472_v58 = vld [vmem:[#allocation5 + $0x3] ss:$8 sm:$0x7] }
 0x330   :  { %v389_v63 = vpop.f32.mrb[11].mxu0  ;;  %v1255_v0 = vpop.f32.mrb[11].mxu1 }
 0x331   :  { %v440_v24 = vrot.slane %v433_v60, %v1653_v35 }
 0x333   :  { %v447_v29 = vrot.slane %v440_v24, %v1653_v35  ;;  %v583_v24 = vrot.slane %v472_v58, 2 }
 0x335   :  { %v449_v30 = vadd.f32 %v447_v29, %v348_v27 }
 0x337   :  { %v1117_v31 = vmul.f32 -1.442695, %v449_v30 }
 0x339   :  { %1384 = vpow2.f32 %v1117_v31 }
 0x343   :  { %v1385_v32 = vpop.eup %1384 }
 0x344   :  { %v453_v33 = vadd.f32 1.0, %v1385_v32 }
 0x346   :  { %1386 = vrcp.f32 %v453_v33 }
 0x350   :  { %v1387_v37 = vpop.eup %1386 }
 0x351   :  { %v457_v38 = vmul.f32 %v1387_v37, %v456_v34  ;;  %v464_v40 = vrot.slane %v1387_v37, 1 }
 0x353   :  { %v461_v39 = vadd.f32 %v459_v36, %v457_v38  ;;  %v466_v41 = vsub.f32 1.0, %v464_v40  ;;  %v468_v44 = vmul.f32 %v464_v40, %v1708_v54 }
 0x355   :  { %1388 = vtanh.f32 %v461_v39 }
 0x35f   :  { %v1389_v42 = vpop.eup %1388 }
 0x360   :  { %v467_v43 = vmul.f32 %v1389_v42, %v466_v41 }
 0x362   :  { %v1752_v45 = vadd.f32 %v468_v44, %v467_v43 }
 0x364   :  { %470 = vst [vmem:[#allocation8 + $0x2] sm:$0x1] %v1752_v45  ;;  %v473_v46 = vpack.c.bf16 %v1752_v45, %v1752_v45 }
 0x366   :  { %507 = vmatmul.mubr.bf16.vlgmr.msra.gmra.mrb[12].mxu0 %v473_v46  ;;  %1273 = vmatmul.mubr.bf16.vlgmr.msra.gmra.mrb[12].mxu1 %v473_v46 }
 0x367   :  { %599 = vmatpush1.bf16.msra.mxu0 %v1531_v2  ;;  %1277 = vmatpush3.bf16.msra.mxu1 %v1546_v8 }
 0x368   :  { %600 = vmatprep.subr.bf16.mxu0 %v1533_v3  ;;  %1278 = vmatprep.subr.bf16.mxu1 %v1481_v4 }
 0x369   :  { %630 = vmatprep.mubr.bf16.mxu0 %v1482_v5  ;;  %1292 = vmatprep.mubr.msk.bf16.mxu1 %vm1483_vm0, %v1481_v4 }
 0x36b   :  { %601 = vmatpush1.bf16.msra.mxu0 %v1540_v6  ;;  %1279 = vmatpush3.bf16.msra.mxu1 %v1554_v10 }
 0x36c   :  { %602 = vmatprep.subr.bf16.mxu0 %v1544_v7  ;;  %1280 = vmatprep.subr.bf16.mxu1 %v1481_v4 }
 0x36f   :  { %603 = vmatpush1.bf16.msra.mxu0 %v1551_v9  ;;  %1281 = vmatpush3.bf16.msra.mxu1 %v1564_v13 }
 0x370   :  { %604 = vmatprep.subr.bf16.mxu0 %v1556_v11  ;;  %1282 = vmatprep.subr.bf16.mxu1 %v1481_v4 }
 0x373   :  { %605 = vmatpush1.bf16.msra.mxu0 %v1561_v12  ;;  %1283 = vmatpush3.bf16.msra.mxu1 %v1574_v16 }
 0x374   :  { %606 = vmatprep.subr.bf16.mxu0 %v1566_v14  ;;  %1284 = vmatprep.subr.bf16.mxu1 %v1481_v4 }
 0x377   :  { %607 = vmatpush1.bf16.msra.mxu0 %v1571_v15  ;;  %1285 = vmatpush3.bf16.msra.mxu1 %v1584_v19 }
 0x378   :  { %608 = vmatprep.subr.bf16.mxu0 %v1576_v17  ;;  %1286 = vmatprep.subr.bf16.mxu1 %v1481_v4 }
 0x37b   :  { %609 = vmatpush1.bf16.msra.mxu0 %v1581_v18  ;;  %1287 = vmatpush3.bf16.msra.mxu1 %v1594_v22 }
 0x37c   :  { %610 = vmatprep.subr.bf16.mxu0 %v1586_v20  ;;  %1288 = vmatprep.subr.bf16.mxu1 %v1481_v4 }
 0x37f   :  { %611 = vmatpush1.bf16.msra.mxu0 %v1591_v21  ;;  %1289 = vmatpush3.bf16.msra.mxu1 %v1606_v26 }
 0x380   :  { %612 = vmatprep.subr.bf16.mxu0 %v1596_v23  ;;  %1290 = vmatprep.subr.bf16.mxu1 %v1481_v4 }
 0x383   :  { %613 = vmatpush1.bf16.msra.mxu0 %v1603_v25  ;;  %1291 = vmatpush3.bf16.msra.mxu1 %v1613_v28 }
 0x384   :  { %722 = vmatprep.subr.bf16.mxu0 %v1529_v1  ;;  %1296 = vmatprep.subr.bf16.mxu1 %v1481_v4 }
 0x439   :  { %v508_v47 = vpop.f32.mrb[12].mxu0  ;;  %v549_v48 = vpop.f32.mrb[12].mxu1 }
 0x43a   :  { %v510_v49 = vpop.f32.mrb[13].mxu0  ;;  %v1274_v50 = vpop.f32.mrb[13].mxu1  ;;  %v580_v0 = vadd.f32 %v549_v48, %v1660_v51 }
 0x43b   :  { %v557_v52 = vcombine.low %v508_v47, %v510_v49  ;;  %v512_v53 = vpop.f32.mrb[14].mxu0  ;;  %v552_v54 = vpop.f32.mrb[14].mxu1  ;;  %v596_v49 = vld [vmem:[#allocation5 + $0x4] ss:$8 sm:$0x7] }
 0x43c   :  { %v513_v55 = vpop.f32.mrb[15].mxu0  ;;  %v1275_v56 = vpop.f32.mrb[15].mxu1 }
 0x43d   :  { %v564_v57 = vrot.slane %v557_v52, %v1653_v35 }
 0x43f   :  { %v571_v59 = vrot.slane %v564_v57, %v1653_v35  ;;  %v707_v57 = vrot.slane %v596_v49, 2 }
 0x441   :  { %v573_v60 = vadd.f32 %v571_v59, %v472_v58 }
 0x443   :  { %v1118_v61 = vmul.f32 -1.442695, %v573_v60 }
 0x445   :  { %1390 = vpow2.f32 %v1118_v61 }
 0x44f   :  { %v1391_v62 = vpop.eup %1390 }
 0x450   :  { %v577_v63 = vadd.f32 1.0, %v1391_v62 }
 0x452   :  { %1392 = vrcp.f32 %v577_v63 }
 0x45c   :  { %v1393_v27 = vpop.eup %1392 }
 0x45d   :  { %v581_v29 = vmul.f32 %v1393_v27, %v580_v0  ;;  %v588_v31 = vrot.slane %v1393_v27, 1 }
 0x45f   :  { %v585_v30 = vadd.f32 %v583_v24, %v581_v29  ;;  %v590_v32 = vsub.f32 1.0, %v588_v31  ;;  %v592_v36 = vmul.f32 %v588_v31, %v1752_v45 }
 0x461   :  { %1394 = vtanh.f32 %v585_v30 }
 0x46b   :  { %v1395_v33 = vpop.eup %1394 }
 0x46c   :  { %v591_v34 = vmul.f32 %v1395_v33, %v590_v32 }
 0x46e   :  { %v1796_v37 = vadd.f32 %v592_v36, %v591_v34 }
 0x470   :  { %594 = vst [vmem:[#allocation8 + $0x3] sm:$0x1] %v1796_v37  ;;  %v597_v38 = vpack.c.bf16 %v1796_v37, %v1796_v37 }
 0x472   :  { %631 = vmatmul.mubr.bf16.vlgmr.msra.gmra.mrb[16].mxu0 %v597_v38  ;;  %1293 = vmatmul.mubr.bf16.vlgmr.msra.gmra.mrb[16].mxu1 %v597_v38 }
 0x473   :  { %723 = vmatpush1.bf16.msra.mxu0 %v1531_v2  ;;  %1297 = vmatpush3.bf16.msra.mxu1 %v1546_v8 }
 0x474   :  { %724 = vmatprep.subr.bf16.mxu0 %v1533_v3  ;;  %1298 = vmatprep.subr.bf16.mxu1 %v1481_v4 }
 0x475   :  { %754 = vmatprep.mubr.bf16.mxu0 %v1482_v5  ;;  %1312 = vmatprep.mubr.msk.bf16.mxu1 %vm1483_vm0, %v1481_v4 }
 0x477   :  { %725 = vmatpush1.bf16.msra.mxu0 %v1540_v6  ;;  %1299 = vmatpush3.bf16.msra.mxu1 %v1554_v10 }
 0x478   :  { %726 = vmatprep.subr.bf16.mxu0 %v1544_v7  ;;  %1300 = vmatprep.subr.bf16.mxu1 %v1481_v4 }
 0x47b   :  { %727 = vmatpush1.bf16.msra.mxu0 %v1551_v9  ;;  %1301 = vmatpush3.bf16.msra.mxu1 %v1564_v13 }
 0x47c   :  { %728 = vmatprep.subr.bf16.mxu0 %v1556_v11  ;;  %1302 = vmatprep.subr.bf16.mxu1 %v1481_v4 }
 0x47f   :  { %729 = vmatpush1.bf16.msra.mxu0 %v1561_v12  ;;  %1303 = vmatpush3.bf16.msra.mxu1 %v1574_v16 }
 0x480   :  { %730 = vmatprep.subr.bf16.mxu0 %v1566_v14  ;;  %1304 = vmatprep.subr.bf16.mxu1 %v1481_v4 }
 0x483   :  { %731 = vmatpush1.bf16.msra.mxu0 %v1571_v15  ;;  %1305 = vmatpush3.bf16.msra.mxu1 %v1584_v19 }
 0x484   :  { %732 = vmatprep.subr.bf16.mxu0 %v1576_v17  ;;  %1306 = vmatprep.subr.bf16.mxu1 %v1481_v4 }
 0x487   :  { %733 = vmatpush1.bf16.msra.mxu0 %v1581_v18  ;;  %1307 = vmatpush3.bf16.msra.mxu1 %v1594_v22 }
 0x488   :  { %734 = vmatprep.subr.bf16.mxu0 %v1586_v20  ;;  %1308 = vmatprep.subr.bf16.mxu1 %v1481_v4 }
 0x48b   :  { %735 = vmatpush1.bf16.msra.mxu0 %v1591_v21  ;;  %1309 = vmatpush3.bf16.msra.mxu1 %v1606_v26 }
 0x48c   :  { %736 = vmatprep.subr.bf16.mxu0 %v1596_v23  ;;  %1310 = vmatprep.subr.bf16.mxu1 %v1481_v4 }
 0x48f   :  { %737 = vmatpush1.bf16.msra.mxu0 %v1603_v25  ;;  %1311 = vmatpush3.bf16.msra.mxu1 %v1613_v28 }
 0x490   :  { %846 = vmatprep.subr.bf16.mxu0 %v1529_v1  ;;  %1316 = vmatprep.subr.bf16.mxu1 %v1481_v4 }
 0x545   :  { %v632_v39 = vpop.f32.mrb[16].mxu0  ;;  %v673_v40 = vpop.f32.mrb[16].mxu1 }
 0x546   :  { %v634_v41 = vpop.f32.mrb[17].mxu0  ;;  %v1294_v42 = vpop.f32.mrb[17].mxu1  ;;  %v704_v56 = vadd.f32 %v673_v40, %v1660_v51 }
 0x547   :  { %v681_v43 = vcombine.low %v632_v39, %v634_v41  ;;  %v636_v44 = vpop.f32.mrb[18].mxu0  ;;  %v676_v45 = vpop.f32.mrb[18].mxu1  ;;  %v720_v41 = vld [vmem:[#allocation5 + $0x5] ss:$8 sm:$0x7] }
 0x548   :  { %v637_v46 = vpop.f32.mrb[19].mxu0  ;;  %v1295_v47 = vpop.f32.mrb[19].mxu1 }
 0x549   :  { %v688_v48 = vrot.slane %v681_v43, %v1653_v35  ;;  %v831_v47 = vrot.slane %v720_v41, 2 }
 0x54b   :  { %v695_v50 = vrot.slane %v688_v48, %v1653_v35 }
 0x54d   :  { %v697_v52 = vadd.f32 %v695_v50, %v596_v49 }
 0x54f   :  { %v1119_v53 = vmul.f32 -1.442695, %v697_v52 }
 0x551   :  { %1396 = vpow2.f32 %v1119_v53 }
 0x55b   :  { %v1397_v54 = vpop.eup %1396 }
 0x55c   :  { %v701_v55 = vadd.f32 1.0, %v1397_v54 }
 0x55e   :  { %1398 = vrcp.f32 %v701_v55 }
 0x568   :  { %v1399_v58 = vpop.eup %1398 }
 0x569   :  { %v705_v59 = vmul.f32 %v1399_v58, %v704_v56  ;;  %v712_v61 = vrot.slane %v1399_v58, 1 }
 0x56b   :  { %v709_v60 = vadd.f32 %v707_v57, %v705_v59  ;;  %v714_v62 = vsub.f32 1.0, %v712_v61  ;;  %v716_v24 = vmul.f32 %v712_v61, %v1796_v37 }
 0x56d   :  { %1400 = vtanh.f32 %v709_v60 }
 0x577   :  { %v1401_v63 = vpop.eup %1400 }
 0x578   :  { %v715_v0 = vmul.f32 %v1401_v63, %v714_v62 }
 0x57a   :  { %v1840_v27 = vadd.f32 %v716_v24, %v715_v0 }
 0x57c   :  { %718 = vst [vmem:[#allocation8 + $0x4] sm:$0x1] %v1840_v27  ;;  %v721_v29 = vpack.c.bf16 %v1840_v27, %v1840_v27 }
 0x57e   :  { %755 = vmatmul.mubr.bf16.vlgmr.msra.gmra.mrb[20].mxu0 %v721_v29  ;;  %1313 = vmatmul.mubr.bf16.vlgmr.msra.gmra.mrb[20].mxu1 %v721_v29 }
 0x57f   :  { %847 = vmatpush1.bf16.msra.mxu0 %v1531_v2  ;;  %1317 = vmatpush3.bf16.msra.mxu1 %v1546_v8 }
 0x580   :  { %848 = vmatprep.subr.bf16.mxu0 %v1533_v3  ;;  %1318 = vmatprep.subr.bf16.mxu1 %v1481_v4 }
 0x581   :  { %878 = vmatprep.mubr.bf16.mxu0 %v1482_v5  ;;  %1332 = vmatprep.mubr.msk.bf16.mxu1 %vm1483_vm0, %v1481_v4 }
 0x583   :  { %849 = vmatpush1.bf16.msra.mxu0 %v1540_v6  ;;  %1319 = vmatpush3.bf16.msra.mxu1 %v1554_v10 }
 0x584   :  { %850 = vmatprep.subr.bf16.mxu0 %v1544_v7  ;;  %1320 = vmatprep.subr.bf16.mxu1 %v1481_v4 }
 0x587   :  { %851 = vmatpush1.bf16.msra.mxu0 %v1551_v9  ;;  %1321 = vmatpush3.bf16.msra.mxu1 %v1564_v13 }
 0x588   :  { %852 = vmatprep.subr.bf16.mxu0 %v1556_v11  ;;  %1322 = vmatprep.subr.bf16.mxu1 %v1481_v4 }
 0x58b   :  { %853 = vmatpush1.bf16.msra.mxu0 %v1561_v12  ;;  %1323 = vmatpush3.bf16.msra.mxu1 %v1574_v16 }
 0x58c   :  { %854 = vmatprep.subr.bf16.mxu0 %v1566_v14  ;;  %1324 = vmatprep.subr.bf16.mxu1 %v1481_v4 }
 0x58f   :  { %855 = vmatpush1.bf16.msra.mxu0 %v1571_v15  ;;  %1325 = vmatpush3.bf16.msra.mxu1 %v1584_v19 }
 0x590   :  { %856 = vmatprep.subr.bf16.mxu0 %v1576_v17  ;;  %1326 = vmatprep.subr.bf16.mxu1 %v1481_v4 }
 0x593   :  { %857 = vmatpush1.bf16.msra.mxu0 %v1581_v18  ;;  %1327 = vmatpush3.bf16.msra.mxu1 %v1594_v22 }
 0x594   :  { %858 = vmatprep.subr.bf16.mxu0 %v1586_v20  ;;  %1328 = vmatprep.subr.bf16.mxu1 %v1481_v4 }
 0x597   :  { %859 = vmatpush1.bf16.msra.mxu0 %v1591_v21  ;;  %1329 = vmatpush3.bf16.msra.mxu1 %v1606_v26 }
 0x598   :  { %860 = vmatprep.subr.bf16.mxu0 %v1596_v23  ;;  %1330 = vmatprep.subr.bf16.mxu1 %v1481_v4 }
 0x59b   :  { %861 = vmatpush1.bf16.msra.mxu0 %v1603_v25  ;;  %1331 = vmatpush3.bf16.msra.mxu1 %v1613_v28 }
 0x59c   :  { %970 = vmatprep.subr.bf16.mxu0 %v1529_v1  ;;  %1336 = vmatprep.subr.bf16.mxu1 %v1481_v4 }
 0x651   :  { %v756_v30 = vpop.f32.mrb[20].mxu0  ;;  %v797_v31 = vpop.f32.mrb[20].mxu1 }
 0x652   :  { %v758_v32 = vpop.f32.mrb[21].mxu0  ;;  %v1314_v33 = vpop.f32.mrb[21].mxu1  ;;  %v828_v46 = vadd.f32 %v797_v31, %v1660_v51 }
 0x653   :  { %v805_v34 = vcombine.low %v756_v30, %v758_v32  ;;  %v760_v36 = vpop.f32.mrb[22].mxu0  ;;  %v800_v37 = vpop.f32.mrb[22].mxu1 }
 0x654   :  { %v761_v38 = vpop.f32.mrb[23].mxu0  ;;  %v1315_v39 = vpop.f32.mrb[23].mxu1 }
 0x655   :  { %v812_v40 = vrot.slane %v805_v34, %v1653_v35  ;;  %v968_v34 = vld [vmem:[#allocation5 + $0x7] ss:$8 sm:$0x7] }
 0x657   :  { %v819_v42 = vrot.slane %v812_v40, %v1653_v35 }
 0x659   :  { %v821_v43 = vadd.f32 %v819_v42, %v720_v41  ;;  %v1079_v42 = vrot.slane %v968_v34, 2 }
 0x65b   :  { %v1120_v44 = vmul.f32 -1.442695, %v821_v43 }
 0x65d   :  { %1402 = vpow2.f32 %v1120_v44 }
 0x667   :  { %v1403_v1 = vpop.eup %1402 }
 0x668   :  { %v825_v45 = vadd.f32 1.0, %v1403_v1 }
 0x66a   :  { %1404 = vrcp.f32 %v825_v45 }
 0x674   :  { %v1405_v48 = vpop.eup %1404 }
 0x675   :  { %v829_v49 = vmul.f32 %v1405_v48, %v828_v46  ;;  %v836_v52 = vrot.slane %v1405_v48, 1 }
 0x677   :  { %v833_v50 = vadd.f32 %v831_v47, %v829_v49  ;;  %v838_v53 = vsub.f32 1.0, %v836_v52  ;;  %v840_v56 = vmul.f32 %v836_v52, %v1840_v27 }
 0x679   :  { %1406 = vtanh.f32 %v833_v50 }
 0x683   :  { %v1407_v54 = vpop.eup %1406 }
 0x684   :  { %v839_v55 = vmul.f32 %v1407_v54, %v838_v53 }
 0x686   :  { %v1884_v57 = vadd.f32 %v840_v56, %v839_v55 }
 0x688   :  { %842 = vst [vmem:[#allocation8 + $0x5] sm:$0x1] %v1884_v57  ;;  %v845_v58 = vpack.c.bf16 %v1884_v57, %v1884_v57 }
 0x68a   :  { %879 = vmatmul.mubr.bf16.vlgmr.msra.gmra.mrb[24].mxu0 %v845_v58  ;;  %1333 = vmatmul.mubr.bf16.vlgmr.msra.gmra.mrb[24].mxu1 %v845_v58 }
 0x68b   :  { %971 = vmatpush1.bf16.msra.mxu0 %v1531_v2  ;;  %1337 = vmatpush3.bf16.msra.mxu1 %v1546_v8 }
 0x68c   :  { %972 = vmatprep.subr.bf16.mxu0 %v1533_v3  ;;  %1338 = vmatprep.subr.bf16.mxu1 %v1481_v4 }
 0x68d   :  { %1002 = vmatprep.mubr.bf16.mxu0 %v1482_v5  ;;  %1352 = vmatprep.mubr.msk.bf16.mxu1 %vm1483_vm0, %v1481_v4 }
 0x68f   :  { %973 = vmatpush1.bf16.msra.mxu0 %v1540_v6  ;;  %1339 = vmatpush3.bf16.msra.mxu1 %v1554_v10 }
 0x690   :  { %974 = vmatprep.subr.bf16.mxu0 %v1544_v7  ;;  %1340 = vmatprep.subr.bf16.mxu1 %v1481_v4 }
 0x693   :  { %975 = vmatpush1.bf16.msra.mxu0 %v1551_v9  ;;  %1341 = vmatpush3.bf16.msra.mxu1 %v1564_v13  ;;  %v844_v13 = vld [vmem:[#allocation5 + $0x6] ss:$8 sm:$0x7] }
 0x694   :  { %976 = vmatprep.subr.bf16.mxu0 %v1556_v11  ;;  %1342 = vmatprep.subr.bf16.mxu1 %v1481_v4 }
 0x697   :  { %977 = vmatpush1.bf16.msra.mxu0 %v1561_v12  ;;  %1343 = vmatpush3.bf16.msra.mxu1 %v1574_v16 }
 0x698   :  { %978 = vmatprep.subr.bf16.mxu0 %v1566_v14  ;;  %1344 = vmatprep.subr.bf16.mxu1 %v1481_v4 }
 0x69b   :  { %979 = vmatpush1.bf16.msra.mxu0 %v1571_v15  ;;  %1345 = vmatpush3.bf16.msra.mxu1 %v1584_v19  ;;  %v955_v19 = vrot.slane %v844_v13, 2 }
 0x69c   :  { %980 = vmatprep.subr.bf16.mxu0 %v1576_v17  ;;  %1346 = vmatprep.subr.bf16.mxu1 %v1481_v4 }
 0x69f   :  { %981 = vmatpush1.bf16.msra.mxu0 %v1581_v18  ;;  %1347 = vmatpush3.bf16.msra.mxu1 %v1594_v22 }
 0x6a0   :  { %982 = vmatprep.subr.bf16.mxu0 %v1586_v20  ;;  %1348 = vmatprep.subr.bf16.mxu1 %v1481_v4 }
 0x6a3   :  { %983 = vmatpush1.bf16.msra.mxu0 %v1591_v21  ;;  %1349 = vmatpush3.bf16.msra.mxu1 %v1606_v26 }
 0x6a4   :  { %984 = vmatprep.subr.bf16.mxu0 %v1596_v23  ;;  %1350 = vmatprep.subr.bf16.mxu1 %v1481_v4 }
 0x6a7   :  { %985 = vmatpush1.bf16.msra.mxu0 %v1603_v25  ;;  %1351 = vmatpush3.bf16.msra.mxu1 %v1613_v28 }
 0x75d   :  { %v880_v2 = vpop.f32.mrb[24].mxu0  ;;  %v921_v3 = vpop.f32.mrb[24].mxu1 }
 0x75e   :  { %v882_v5 = vpop.f32.mrb[25].mxu0  ;;  %v1334_v6 = vpop.f32.mrb[25].mxu1  ;;  %v952_v18 = vadd.f32 %v921_v3, %v1660_v51 }
 0x75f   :  { %v929_v7 = vcombine.low %v880_v2, %v882_v5  ;;  %v884_v8 = vpop.f32.mrb[26].mxu0  ;;  %v924_v9 = vpop.f32.mrb[26].mxu1 }
 0x760   :  { %v885_v10 = vpop.f32.mrb[27].mxu0  ;;  %v1335_v11 = vpop.f32.mrb[27].mxu1 }
 0x761   :  { %v936_v12 = vrot.slane %v929_v7, %v1653_v35 }
 0x763   :  { %v943_v14 = vrot.slane %v936_v12, %v1653_v35 }
 0x765   :  { %v945_v15 = vadd.f32 %v943_v14, %v844_v13 }
 0x767   :  { %v1121_v4 = vmul.f32 -1.442695, %v945_v15 }
 0x769   :  { %1408 = vpow2.f32 %v1121_v4 }
 0x773   :  { %v1409_v16 = vpop.eup %1408 }
 0x774   :  { %v949_v17 = vadd.f32 1.0, %v1409_v16 }
 0x776   :  { %1410 = vrcp.f32 %v949_v17 }
 0x780   :  { %v1411_v20 = vpop.eup %1410 }
 0x781   :  { %v953_v21 = vmul.f32 %v1411_v20, %v952_v18  ;;  %v960_v23 = vrot.slane %v1411_v20, 1 }
 0x783   :  { %v957_v22 = vadd.f32 %v955_v19, %v953_v21  ;;  %v962_v25 = vsub.f32 1.0, %v960_v23  ;;  %v964_v59 = vmul.f32 %v960_v23, %v1884_v57 }
 0x785   :  { %1412 = vtanh.f32 %v957_v22 }
 0x78f   :  { %v1413_v26 = vpop.eup %1412 }
 0x790   :  { %v963_v28 = vmul.f32 %v1413_v26, %v962_v25 }
 0x792   :  { %v965_v60 = vadd.f32 %v964_v59, %v963_v28 }
 0x794   :  { %966 = vst [vmem:[#allocation8 + $0x6] sm:$0x1] %v965_v60  ;;  %v969_v61 = vpack.c.bf16 %v965_v60, %v965_v60 }
 0x796   :  { %1003 = vmatmul.mubr.bf16.vlgmr.msra.gmra.mrb[28].mxu0 %v969_v61  ;;  %1353 = vmatmul.mubr.bf16.vlgmr.msra.gmra.mrb[28].mxu1 %v969_v61 }
 0x869   :  { %v1004_v62 = vpop.f32.mrb[28].mxu0  ;;  %v1045_v63 = vpop.f32.mrb[28].mxu1 }
 0x86a   :  { %v1006_v0 = vpop.f32.mrb[29].mxu0  ;;  %v1354_v24 = vpop.f32.mrb[29].mxu1  ;;  %v1076_v41 = vadd.f32 %v1045_v63, %v1660_v51 }
 0x86b   :  { %v1053_v27 = vcombine.low %v1004_v62, %v1006_v0  ;;  %v1008_v29 = vpop.f32.mrb[30].mxu0  ;;  %v1048_v30 = vpop.f32.mrb[30].mxu1 }
 0x86c   :  { %v1009_v31 = vpop.f32.mrb[31].mxu0  ;;  %v1355_v32 = vpop.f32.mrb[31].mxu1 }
 0x86d   :  { %v1060_v33 = vrot.slane %v1053_v27, %v1653_v35 }
 0x86f   :  { %v1067_v36 = vrot.slane %v1060_v33, %v1653_v35 }
 0x871   :  { %v1069_v37 = vadd.f32 %v1067_v36, %v968_v34 }
 0x873   :  { %v1122_v38 = vmul.f32 -1.442695, %v1069_v37 }
 0x875   :  { %1414 = vpow2.f32 %v1122_v38 }
 0x87f   :  { %v1415_v39 = vpop.eup %1414 }
 0x880   :  { %v1073_v40 = vadd.f32 1.0, %v1415_v39 }
 0x882   :  { %1416 = vrcp.f32 %v1073_v40 }
 0x88c   :  { %v1417_v43 = vpop.eup %1416 }
 0x88d   :  { %v1077_v44 = vmul.f32 %v1417_v43, %v1076_v41  ;;  %v1084_v45 = vrot.slane %v1417_v43, 1 }
 0x88f   :  { %v1081_v1 = vadd.f32 %v1079_v42, %v1077_v44  ;;  %v1086_v46 = vsub.f32 1.0, %v1084_v45  ;;  %v1088_v35 = vmul.f32 %v1084_v45, %v965_v60 }
 0x891   :  { %1418 = vtanh.f32 %v1081_v1 }
 0x89b   :  { %v1419_v47 = vpop.eup %1418 }
 0x89c   :  { %v1087_v48 = vmul.f32 %v1419_v47, %v1086_v46 }
 0x89e   :  { %v1089_v49 = vadd.f32 %v1088_v35, %v1087_v48 }
 0x8a0   :  { %1090 = vst [vmem:[#allocation8 + $0x7] sm:$0x1] %v1089_v49  ;;  %1091 = vst [vmem:[#allocation3] sm:$0x1] %v1089_v49 }
 0x8a1   :  { %1453 = shalt.err (!%p1450_p12)
}
 0x8a2   :  { %s1454_s22 = scalar_lea.hbm %s1945_s4, 128 }
 0x8a3   :  { %p1455_p13 = scmp.ne.s32.totalorder %s1945_s4, %s1454_s22  ;;  %p1458_p0 = scmp.lt.u32.totalorder %s1454_s22, %s1945_s4 }
 0x8a5   :  { %p1460_p1 = pnand %p1458_p0, %p1455_p13 }
 0x8a7   :  { %1463 = shalt.err (!%p1460_p1)
}
 0x8a8   :  { %1101 = dma.vmem_to_hbm [thread:$0]  %s1099_s18, 128, %s1945_s4, [#allocation7]  }
 0x8a9   :  { %1468 = dma.done.wait [#allocation7], 128  }
 0x8aa   :  { %1469 = vsyncadd [#allocation7], 4294967168 }
 0x8ab   :  { %1105 = vsyncpa [#allocation6], 1 }
 0x8ac   :  { %1106 = vsyncpa [#allocation7], 1 }
 0x8ad   :  { %1107 = vsyncmov [#allocation4] }
 0x8b0   :  { %s1108_s29 = vpop.sfrf %1107 }
 0x8b1   :  { %p1123_p2 = scmp.ne.s32.totalorder %s1108_s29, 0 }
 0x8b3   :  { %1112 = shalt.err (%p1123_p2)  }

</bundles_post_ra>
